<compile_context>
chip_gen: v5e
topology: v5e:2x2
jax: 0.10.0
libtpu: 0.0.40
codegen_flags: <defaults>
</compile_context>

<pallas_src>
import functools

import numpy as np
import jax
import jax.numpy as jnp
from jax.experimental import pallas as pl
from jax.experimental.pallas import tpu as pltpu

num_arms = 3
thresholds = [[0, 1],
              [0, 0.1, 0.2, 0.3, 0.4, 0.5, 0.6, 0.7, 0.8, 0.9, 1],
              [0, 0.25, 0.5, 0.75, 1],
              [0, 0.3, 0.6, 0.9, 1]]
num_strata = int(np.sum([len(t) for t in thresholds]))   # 23
len_state = num_strata * num_arms                        # 69
len_extended_state = len_state + num_strata              # 92
HIDDEN = 512

F_PAD = 128   # input features padded 92 -> 128 (lane aligned K for layer 1)
N_PAD = 128   # output lanes padded 3 -> 128 (lane-dense output stores)


def _round_up(n, m):
    return ((n + m - 1) // m) * m


def actor_kernel(x_ref, w1_ref, b1_ref, w2_ref, b2_ref, w3_ref, b3_ref, out_ref):
    # x block: (TB, 128) f32; weights bf16 (resident); biases f32.
    x = x_ref[...]

    # Layer 1: bf16 MXU operands, f32 accumulation.
    h1 = jnp.dot(x.astype(jnp.bfloat16), w1_ref[...],
                 preferred_element_type=jnp.float32) + b1_ref[...]
    h1 = jnp.maximum(h1, 0.0)

    # Layer 2
    h2 = jnp.dot(h1.astype(jnp.bfloat16), w2_ref[...],
                 preferred_element_type=jnp.float32) + b2_ref[...]
    h2 = jnp.maximum(h2, 0.0)

    # Layer 3 -> (TB, 128) padded scores
    s = jnp.dot(h2.astype(jnp.bfloat16), w3_ref[...],
                preferred_element_type=jnp.float32) + b3_ref[...]

    # Softmax over the real num_arms lanes only; padded lanes -> -inf -> prob 0.
    lane = jax.lax.broadcasted_iota(jnp.int32, s.shape, 1)
    s = jnp.where(lane < num_arms, s, -jnp.inf)
    m = jnp.max(s, axis=-1, keepdims=True)
    e = jnp.exp(s - m)
    denom = jnp.sum(e, axis=-1, keepdims=True)
    out_ref[...] = e * pl.reciprocal(denom, approx=True)


@functools.partial(jax.jit, static_argnames=("tb",))
def actor_forward(x, params, tb=512):
    """x: [B, 92] f32; params: f32 weights in [in, out] layout, biases [1, out]."""
    w1, b1, w2, b2, w3, b3 = params
    B, Fin = x.shape

    # Tile size: multiple of 8 sublanes, capped by the (padded) batch.
    tb = min(tb, _round_up(max(B, 1), 8))
    b_pad = _round_up(B, tb)

    # Pad batch + feature dims; pad/cast weights (bf16 for the MXU, zeros in pads).
    x_p = jnp.zeros((b_pad, F_PAD), jnp.float32).at[:B, :Fin].set(x)
    w1_p = jnp.zeros((F_PAD, HIDDEN), jnp.float32).at[:Fin, :].set(w1).astype(jnp.bfloat16)
    w2_p = w2.astype(jnp.bfloat16)
    w3_p = jnp.zeros((HIDDEN, N_PAD), jnp.float32).at[:, :num_arms].set(w3).astype(jnp.bfloat16)
    b3_p = jnp.zeros((1, N_PAD), jnp.float32).at[:, :num_arms].set(b3)

    out = pl.pallas_call(
        actor_kernel,
        out_shape=jax.ShapeDtypeStruct((b_pad, N_PAD), jnp.float32),
        grid=(b_pad // tb,),
        in_specs=[
            pl.BlockSpec((tb, F_PAD), lambda i: (i, 0)),        # x tile (pipelined)
            pl.BlockSpec((F_PAD, HIDDEN), lambda i: (0, 0)),    # W1 (resident)
            pl.BlockSpec((1, HIDDEN), lambda i: (0, 0)),        # b1
            pl.BlockSpec((HIDDEN, HIDDEN), lambda i: (0, 0)),   # W2 (resident)
            pl.BlockSpec((1, HIDDEN), lambda i: (0, 0)),        # b2
            pl.BlockSpec((HIDDEN, N_PAD), lambda i: (0, 0)),    # W3 (resident)
            pl.BlockSpec((1, N_PAD), lambda i: (0, 0)),         # b3
        ],
        out_specs=pl.BlockSpec((tb, N_PAD), lambda i: (i, 0)),
        compiler_params=pltpu.CompilerParams(
            dimension_semantics=("parallel",)),                 # v7x megacore over batch
    )(x_p, w1_p, b1, w2_p, b2, w3_p, b3_p)

    return out[:B, :num_arms]


def init_params(key):
    """Deterministic PyTorch-style Linear init: U(-1/sqrt(fan_in), +1/sqrt(fan_in))."""
    def linear(key, fan_in, fan_out):
        kw, kb = jax.random.split(key)
        bound = 1.0 / np.sqrt(fan_in)
        w = jax.random.uniform(kw, (fan_in, fan_out), jnp.float32, -bound, bound)
        b = jax.random.uniform(kb, (1, fan_out), jnp.float32, -bound, bound)
        return w, b

    k1, k2, k3 = jax.random.split(key, 3)
    w1, b1 = linear(k1, len_extended_state, HIDDEN)
    w2, b2 = linear(k2, HIDDEN, HIDDEN)
    w3, b3 = linear(k3, HIDDEN, num_arms)
    return (w1, b1, w2, b2, w3, b3)


def actor_reference(x, params):
    """Pure-JAX f32 reference of the PyTorch forward."""
    w1, b1, w2, b2, w3, b3 = params
    h1 = jnp.maximum(x @ w1 + b1, 0.0)
    h2 = jnp.maximum(h1 @ w2 + b2, 0.0)
    s = h2 @ w3 + b3
    return jax.nn.softmax(s, axis=1)


if __name__ == "__main__":
    key = jax.random.PRNGKey(0)
    kp, kx1, kx2 = jax.random.split(key, 3)
    params = init_params(kp)

    # Small demo batch (single grid step).
    batch = 2
    x = jax.random.uniform(kx1, (batch, len_extended_state), jnp.float32)
    probs = jax.block_until_ready(actor_forward(x, params))
    ref = actor_reference(x, params)
    assert probs.shape == (batch, num_arms)
    # bf16 MXU operands (f32 accumulation) -> loosened tolerance vs f32 reference.
    np.testing.assert_allclose(np.asarray(probs), np.asarray(ref), rtol=2.5e-2, atol=2.5e-2)
    np.testing.assert_allclose(np.asarray(probs).sum(axis=1), np.ones(batch), atol=5e-3)

    # Multi-block grid path with a ragged tail (B=260, TB=128 -> 3 grid steps, padded rows).
    batch2 = 260
    x2 = jax.random.uniform(kx2, (batch2, len_extended_state), jnp.float32)
    probs2 = jax.block_until_ready(actor_forward(x2, params, tb=128))
    ref2 = actor_reference(x2, params)
    assert probs2.shape == (batch2, num_arms)
    np.testing.assert_allclose(np.asarray(probs2), np.asarray(ref2), rtol=2.5e-2, atol=2.5e-2)
    np.testing.assert_allclose(np.asarray(probs2).sum(axis=1), np.ones(batch2), atol=5e-3)

    print("KERNEL_OK")
</pallas_src>

<mosaic_0001>
module attributes {stable_mosaic.version = 11 : i64} {
  func.func @actor_kernel(%arg0: i32, %arg1: memref<8x128xf32, #tpu.memory_space<vmem>>, %arg2: memref<128x512xbf16, #tpu.memory_space<vmem>>, %arg3: memref<1x512xf32, #tpu.memory_space<vmem>>, %arg4: memref<512x512xbf16, #tpu.memory_space<vmem>>, %arg5: memref<1x512xf32, #tpu.memory_space<vmem>>, %arg6: memref<512x128xbf16, #tpu.memory_space<vmem>>, %arg7: memref<1x128xf32, #tpu.memory_space<vmem>>, %arg8: memref<8x128xf32, #tpu.memory_space<vmem>>) attributes {dimension_semantics = [#tpu.dimension_semantics<parallel>], iteration_bounds = array<i64: 1>, scalar_prefetch = 0 : i64, scratch_operands = 0 : i64, tpu.core_type = #tpu.core_type<tc>, window_params = [{transform_indices = @transform_0, window_bounds = array<i64: 8, 128>}, {pipeline_mode = #tpu.pipeline_mode<synchronous>, transform_indices = @transform_1, window_bounds = array<i64: 128, 512>}, {pipeline_mode = #tpu.pipeline_mode<synchronous>, transform_indices = @transform_2, window_bounds = array<i64: 1, 512>}, {pipeline_mode = #tpu.pipeline_mode<synchronous>, transform_indices = @transform_3, window_bounds = array<i64: 512, 512>}, {pipeline_mode = #tpu.pipeline_mode<synchronous>, transform_indices = @transform_4, window_bounds = array<i64: 1, 512>}, {pipeline_mode = #tpu.pipeline_mode<synchronous>, transform_indices = @transform_5, window_bounds = array<i64: 512, 128>}, {pipeline_mode = #tpu.pipeline_mode<synchronous>, transform_indices = @transform_6, window_bounds = array<i64: 1, 128>}, {transform_indices = @transform_7, window_bounds = array<i64: 8, 128>}]} {
    %c0 = arith.constant 0 : index
    %c0_0 = arith.constant 0 : index
    %0 = vector.load %arg1[%c0, %c0_0] : memref<8x128xf32, #tpu.memory_space<vmem>>, vector<8x128xf32>
    %1 = arith.truncf %0 : vector<8x128xf32> to vector<8x128xbf16>
    %c0_1 = arith.constant 0 : index
    %c0_2 = arith.constant 0 : index
    %2 = vector.load %arg2[%c0_1, %c0_2] : memref<128x512xbf16, #tpu.memory_space<vmem>>, vector<128x512xbf16>
    %cst = arith.constant dense<0.000000e+00> : vector<8x512xf32>
    %3 = tpu.matmul %1, %2, %cst {dimension_numbers = #tpu.dot_dimension_numbers<[1], [0], [0], [1], [0, 0, 1, 1], [], []>} : vector<8x128xbf16>, vector<128x512xbf16>, vector<8x512xf32> -> vector<8x512xf32>
    %c0_3 = arith.constant 0 : index
    %c0_4 = arith.constant 0 : index
    %4 = vector.load %arg3[%c0_3, %c0_4] : memref<1x512xf32, #tpu.memory_space<vmem>>, vector<1x512xf32>
    %5 = vector.broadcast %4 : vector<1x512xf32> to vector<8x512xf32>
    %6 = arith.addf %3, %5 : vector<8x512xf32>
    %cst_5 = arith.constant 0.000000e+00 : f32
    %7 = vector.broadcast %cst_5 : f32 to vector<8x512xf32>
    %8 = arith.maximumf %6, %7 : vector<8x512xf32>
    %9 = arith.truncf %8 : vector<8x512xf32> to vector<8x512xbf16>
    %c0_6 = arith.constant 0 : index
    %c0_7 = arith.constant 0 : index
    %10 = vector.load %arg4[%c0_6, %c0_7] : memref<512x512xbf16, #tpu.memory_space<vmem>>, vector<512x512xbf16>
    %cst_8 = arith.constant dense<0.000000e+00> : vector<8x512xf32>
    %11 = tpu.matmul %9, %10, %cst_8 {dimension_numbers = #tpu.dot_dimension_numbers<[1], [0], [0], [1], [0, 0, 1, 1], [], []>} : vector<8x512xbf16>, vector<512x512xbf16>, vector<8x512xf32> -> vector<8x512xf32>
    %c0_9 = arith.constant 0 : index
    %c0_10 = arith.constant 0 : index
    %12 = vector.load %arg5[%c0_9, %c0_10] : memref<1x512xf32, #tpu.memory_space<vmem>>, vector<1x512xf32>
    %13 = vector.broadcast %12 : vector<1x512xf32> to vector<8x512xf32>
    %14 = arith.addf %11, %13 : vector<8x512xf32>
    %cst_11 = arith.constant 0.000000e+00 : f32
    %15 = vector.broadcast %cst_11 : f32 to vector<8x512xf32>
    %16 = arith.maximumf %14, %15 : vector<8x512xf32>
    %17 = arith.truncf %16 : vector<8x512xf32> to vector<8x512xbf16>
    %c0_12 = arith.constant 0 : index
    %c0_13 = arith.constant 0 : index
    %18 = vector.load %arg6[%c0_12, %c0_13] : memref<512x128xbf16, #tpu.memory_space<vmem>>, vector<512x128xbf16>
    %cst_14 = arith.constant dense<0.000000e+00> : vector<8x128xf32>
    %19 = tpu.matmul %17, %18, %cst_14 {dimension_numbers = #tpu.dot_dimension_numbers<[1], [0], [0], [1], [0, 0, 1, 1], [], []>} : vector<8x512xbf16>, vector<512x128xbf16>, vector<8x128xf32> -> vector<8x128xf32>
    %c0_15 = arith.constant 0 : index
    %c0_16 = arith.constant 0 : index
    %20 = vector.load %arg7[%c0_15, %c0_16] : memref<1x128xf32, #tpu.memory_space<vmem>>, vector<1x128xf32>
    %21 = vector.broadcast %20 : vector<1x128xf32> to vector<8x128xf32>
    %22 = arith.addf %19, %21 : vector<8x128xf32>
    %23 = tpu.iota {dimensions = array<i32: 1>} : vector<8x128xi32>
    %c3_i32 = arith.constant 3 : i32
    %24 = vector.broadcast %c3_i32 : i32 to vector<8x128xi32>
    %25 = arith.cmpi slt, %23, %24 : vector<8x128xi32>
    %cst_17 = arith.constant 0xFF800000 : f32
    %26 = vector.broadcast %cst_17 : f32 to vector<8x128xf32>
    %27 = arith.select %25, %22, %26 : vector<8x128xi1>, vector<8x128xf32>
    %cst_18 = arith.constant dense<0xFF800000> : vector<8xf32>
    %28 = vector.multi_reduction <maximumf>, %27, %cst_18 [1] : vector<8x128xf32> to vector<8xf32>
    %29 = vector.shape_cast %28 : vector<8xf32> to vector<8x1xf32>
    %30 = vector.broadcast %29 : vector<8x1xf32> to vector<8x128xf32>
    %31 = arith.subf %27, %30 : vector<8x128xf32>
    %32 = math.exp %31 : vector<8x128xf32>
    %cst_19 = arith.constant dense<0.000000e+00> : vector<8xf32>
    %33 = vector.multi_reduction <add>, %32, %cst_19 [1] : vector<8x128xf32> to vector<8xf32>
    %34 = vector.shape_cast %33 : vector<8xf32> to vector<8x1xf32>
    %35 = tpu.reciprocal %34 {approx = true} : vector<8x1xf32> -> vector<8x1xf32>
    %36 = vector.broadcast %35 : vector<8x1xf32> to vector<8x128xf32>
    %37 = arith.mulf %32, %36 : vector<8x128xf32>
    %c0_20 = arith.constant 0 : index
    %c0_21 = arith.constant 0 : index
    %38 = vector.load %arg8[%c0_20, %c0_21] : memref<8x128xf32, #tpu.memory_space<vmem>>, vector<8x128xf32>
    tpu.vector_store %arg8[%c0_20, %c0_21], %37 {strides = array<i32>} : memref<8x128xf32, #tpu.memory_space<vmem>>, vector<8x128xf32>,
    return
  }
  func.func @transform_0(%arg0: i32) -> (i32, i32) {
    %c0_i32 = arith.constant 0 : i32
    %c0_i32_0 = arith.constant 0 : i32
    return %arg0, %c0_i32 : i32, i32
  }
  func.func @transform_1(%arg0: i32) -> (i32, i32) {
    %c0_i32 = arith.constant 0 : i32
    %c0_i32_0 = arith.constant 0 : i32
    %c0_i32_1 = arith.constant 0 : i32
    return %c0_i32, %c0_i32_0 : i32, i32
  }
  func.func @transform_2(%arg0: i32) -> (i32, i32) {
    %c0_i32 = arith.constant 0 : i32
    %c0_i32_0 = arith.constant 0 : i32
    %c0_i32_1 = arith.constant 0 : i32
    return %c0_i32, %c0_i32_0 : i32, i32
  }
  func.func @transform_3(%arg0: i32) -> (i32, i32) {
    %c0_i32 = arith.constant 0 : i32
    %c0_i32_0 = arith.constant 0 : i32
    %c0_i32_1 = arith.constant 0 : i32
    return %c0_i32, %c0_i32_0 : i32, i32
  }
  func.func @transform_4(%arg0: i32) -> (i32, i32) {
    %c0_i32 = arith.constant 0 : i32
    %c0_i32_0 = arith.constant 0 : i32
    %c0_i32_1 = arith.constant 0 : i32
    return %c0_i32, %c0_i32_0 : i32, i32
  }
  func.func @transform_5(%arg0: i32) -> (i32, i32) {
    %c0_i32 = arith.constant 0 : i32
    %c0_i32_0 = arith.constant 0 : i32
    %c0_i32_1 = arith.constant 0 : i32
    return %c0_i32, %c0_i32_0 : i32, i32
  }
  func.func @transform_6(%arg0: i32) -> (i32, i32) {
    %c0_i32 = arith.constant 0 : i32
    %c0_i32_0 = arith.constant 0 : i32
    %c0_i32_1 = arith.constant 0 : i32
    return %c0_i32, %c0_i32_0 : i32, i32
  }
  func.func @transform_7(%arg0: i32) -> (i32, i32) {
    %c0_i32 = arith.constant 0 : i32
    %c0_i32_0 = arith.constant 0 : i32
    return %arg0, %c0_i32 : i32, i32
  }
}

</mosaic_0001>

<bundles_post_ra>
// kernel: actor_forward.1
= control target key start
LH: loop header
LB: loop body
LE: loop exit
PB: predicated region body
PF: predicated region fallthrough
CT: control target
= control target key end

     0   :  { %s3720_s1 = inlined_call_operand.vmem [shape: bf16[128,512], index: 1, kind: input, shape index: {}]   ;;  %s3721_s3 = inlined_call_operand.vmem [shape: bf16[512,512], index: 3, kind: input, shape index: {}]   ;;  %s3722_s0 = inlined_call_operand.vmem [shape: f32[8,128], index: 0, kind: input, shape index: {}]   ;;  %s3723_s2 = inlined_call_operand.vmem [shape: f32[1,512], index: 2, kind: input, shape index: {}]   ;;  %s3724_s5 = inlined_call_operand.vmem [shape: bf16[512,128], index: 5, kind: input, shape index: {}]   ;;  %s3725_s6 = inlined_call_operand.vmem [shape: f32[1,128], index: 6, kind: input, shape index: {}]   ;;  %s3726_s4 = inlined_call_operand.vmem [shape: f32[1,512], index: 4, kind: input, shape index: {}]   ;;  %s3727_s7 = inlined_call_operand.vmem [shape: f32[8,128], index: 7, kind: output, shape index: {}]  }
   0x1   :  { %v1728_v0 = vld [vmem:[%s3720_s1 + $0xe0] sm:$0xf]  ;;  %v2412_v1 = vld [vmem:[%s3720_s1 + $0xec] sm:$0xf0]  ;;  %v2410_v2 = vld [vmem:[%s3720_s1 + $0xe4] sm:$0xf] }
   0x2   :  { %v1729_v3 = vor.u32 %v2412_v1, %v1728_v0  ;;  %v1730_v4 = vld [vmem:[%s3720_s1 + $0xf0] sm:$0xf0]  ;;  %v1736_v5 = vld [vmem:[%s3720_s1 + $0xe8] sm:$0xf]  ;;  %v2413_v6 = vld [vmem:[%s3720_s1 + $0xf4] sm:$0xf0] }
   0x3   :  { %v1733_v7 = vor.u32 %v2410_v2, %v1730_v4  ;;  %v1737_v8 = vor.u32 %v2413_v6, %v1736_v5  ;;  %v2411_v9 = vld [vmem:[%s3720_s1 + $0xec] sm:$0xf]  ;;  %v1738_v10 = vld [vmem:[%s3720_s1 + $0xf8] sm:$0xf0]  ;;  %v1712_v11 = vld [vmem:[%s3720_s1 + $0xc0] sm:$0xf] }
   0x4   :  { %230 = vmatpush.bf16.msra.mxu0 %v1729_v3  ;;  %v1741_v12 = vor.u32 %v2411_v9, %v1738_v10  ;;  %v2408_v13 = vld [vmem:[%s3720_s1 + $0xcc] sm:$0xf0]  ;;  %v2406_v14 = vld [vmem:[%s3720_s1 + $0xc4] sm:$0xf]  ;;  %v1714_v15 = vld [vmem:[%s3720_s1 + $0xd0] sm:$0xf0] }
   0x5   :  { %243 = vmatpush.bf16.msra.mxu1 %v1733_v7  ;;  %256 = vmatpush.bf16.msra.mxu2 %v1737_v8  ;;  %v1713_v16 = vor.u32 %v2408_v13, %v1712_v11  ;;  %v1717_v17 = vor.u32 %v2406_v14, %v1714_v15  ;;  %v1720_v18 = vld [vmem:[%s3720_s1 + $0xc8] sm:$0xf]  ;;  %v2409_v19 = vld [vmem:[%s3720_s1 + $0xd4] sm:$0xf0]  ;;  %v2407_v20 = vld [vmem:[%s3720_s1 + $0xcc] sm:$0xf] }
   0x6   :  { %269 = vmatpush.bf16.msra.mxu3 %v1741_v12  ;;  %v1721_v21 = vor.u32 %v2409_v19, %v1720_v18  ;;  %v1722_v22 = vld [vmem:[%s3720_s1 + $0xd8] sm:$0xf0]  ;;  %v1696_v23 = vld [vmem:[%s3720_s1 + $0xa0] sm:$0xf]  ;;  %v2404_v24 = vld [vmem:[%s3720_s1 + $0xac] sm:$0xf0] }
   0x7   :  { %v1725_v25 = vor.u32 %v2407_v20, %v1722_v22  ;;  %v2402_v26 = vld [vmem:[%s3720_s1 + $0xa4] sm:$0xf]  ;;  %v1698_v27 = vld [vmem:[%s3720_s1 + $0xb0] sm:$0xf0]  ;;  %v1704_v28 = vld [vmem:[%s3720_s1 + $0xa8] sm:$0xf]  ;;  %v1697_v29 = vor.u32 %v2404_v24, %v1696_v23 }
   0x8   :  { %231 = vmatpush.bf16.msra.mxu0 %v1713_v16  ;;  %v2405_v30 = vld [vmem:[%s3720_s1 + $0xb4] sm:$0xf0]  ;;  %v2403_v31 = vld [vmem:[%s3720_s1 + $0xac] sm:$0xf]  ;;  %v1706_v32 = vld [vmem:[%s3720_s1 + $0xb8] sm:$0xf0]  ;;  %v1701_v33 = vor.u32 %v2402_v26, %v1698_v27 }
   0x9   :  { %244 = vmatpush.bf16.msra.mxu1 %v1717_v17  ;;  %257 = vmatpush.bf16.msra.mxu2 %v1721_v21  ;;  %v1705_v34 = vor.u32 %v2405_v30, %v1704_v28  ;;  %v1680_v35 = vld [vmem:[%s3720_s1 + $0x80] sm:$0xf]  ;;  %v2400_v36 = vld [vmem:[%s3720_s1 + $0x8c] sm:$0xf0]  ;;  %v2398_v37 = vld [vmem:[%s3720_s1 + $0x84] sm:$0xf]  ;;  %v1709_v38 = vor.u32 %v2403_v31, %v1706_v32 }
   0xa   :  { %270 = vmatpush.bf16.msra.mxu3 %v1725_v25  ;;  %v1682_v39 = vld [vmem:[%s3720_s1 + $0x90] sm:$0xf0]  ;;  %v1688_v40 = vld [vmem:[%s3720_s1 + $0x88] sm:$0xf]  ;;  %v2401_v41 = vld [vmem:[%s3720_s1 + $0x94] sm:$0xf0]  ;;  %v1681_v44 = vor.u32 %v2400_v36, %v1680_v35 }
   0xb   :  { %v2399_v42 = vld [vmem:[%s3720_s1 + $0x8c] sm:$0xf]  ;;  %v1690_v43 = vld [vmem:[%s3720_s1 + $0x98] sm:$0xf0]  ;;  %v1685_v45 = vor.u32 %v2398_v37, %v1682_v39  ;;  %v1689_v46 = vor.u32 %v2401_v41, %v1688_v40  ;;  %v1664_v47 = vld [vmem:[%s3720_s1 + $0x60] sm:$0xf] }
   0xc   :  { %232 = vmatpush.bf16.msra.mxu0 %v1697_v29  ;;  %v2396_v48 = vld [vmem:[%s3720_s1 + $0x6c] sm:$0xf0]  ;;  %v2394_v49 = vld [vmem:[%s3720_s1 + $0x64] sm:$0xf]  ;;  %v1693_v50 = vor.u32 %v2399_v42, %v1690_v43  ;;  %v1666_v51 = vld [vmem:[%s3720_s1 + $0x70] sm:$0xf0] }
   0xd   :  { %245 = vmatpush.bf16.msra.mxu1 %v1701_v33  ;;  %258 = vmatpush.bf16.msra.mxu2 %v1705_v34  ;;  %v1672_v52 = vld [vmem:[%s3720_s1 + $0x68] sm:$0xf]  ;;  %v2397_v53 = vld [vmem:[%s3720_s1 + $0x74] sm:$0xf0]  ;;  %v2395_v54 = vld [vmem:[%s3720_s1 + $0x6c] sm:$0xf]  ;;  %v1665_v56 = vor.u32 %v2396_v48, %v1664_v47  ;;  %v1669_v57 = vor.u32 %v2394_v49, %v1666_v51 }
   0xe   :  { %271 = vmatpush.bf16.msra.mxu3 %v1709_v38  ;;  %v1674_v55 = vld [vmem:[%s3720_s1 + $0x78] sm:$0xf0]  ;;  %v1673_v58 = vor.u32 %v2397_v53, %v1672_v52  ;;  %v1648_v59 = vld [vmem:[%s3720_s1 + $0x40] sm:$0xf]  ;;  %v2392_v60 = vld [vmem:[%s3720_s1 + $0x4c] sm:$0xf0] }
   0xf   :  { %v2390_v61 = vld [vmem:[%s3720_s1 + $0x44] sm:$0xf]  ;;  %v1677_v62 = vor.u32 %v2395_v54, %v1674_v55  ;;  %v1650_v63 = vld [vmem:[%s3720_s1 + $0x50] sm:$0xf0]  ;;  %v1656_v0 = vld [vmem:[%s3720_s1 + $0x48] sm:$0xf]  ;;  %v1649_v4 = vor.u32 %v2392_v60, %v1648_v59 }
  0x10   :  { %233 = vmatpush.bf16.msra.mxu0 %v1681_v44  ;;  %v2393_v1 = vld [vmem:[%s3720_s1 + $0x54] sm:$0xf0]  ;;  %v2391_v2 = vld [vmem:[%s3720_s1 + $0x4c] sm:$0xf]  ;;  %v1658_v3 = vld [vmem:[%s3720_s1 + $0x58] sm:$0xf0]  ;;  %v1653_v5 = vor.u32 %v2390_v61, %v1650_v63 }
  0x11   :  { %246 = vmatpush.bf16.msra.mxu1 %v1685_v45  ;;  %259 = vmatpush.bf16.msra.mxu2 %v1689_v46  ;;  %v1657_v6 = vor.u32 %v2393_v1, %v1656_v0  ;;  %v1632_v7 = vld [vmem:[%s3720_s1 + $0x20] sm:$0xf]  ;;  %v2388_v8 = vld [vmem:[%s3720_s1 + $0x2c] sm:$0xf0]  ;;  %v2386_v9 = vld [vmem:[%s3720_s1 + $0x24] sm:$0xf]  ;;  %v1661_v10 = vor.u32 %v2391_v2, %v1658_v3 }
  0x12   :  { %272 = vmatpush.bf16.msra.mxu3 %v1693_v50  ;;  %v1634_v11 = vld [vmem:[%s3720_s1 + $0x30] sm:$0xf0]  ;;  %v1640_v12 = vld [vmem:[%s3720_s1 + $0x28] sm:$0xf]  ;;  %v2389_v13 = vld [vmem:[%s3720_s1 + $0x34] sm:$0xf0]  ;;  %v1633_v16 = vor.u32 %v2388_v8, %v1632_v7 }
  0x13   :  { %v2387_v14 = vld [vmem:[%s3720_s1 + $0x2c] sm:$0xf]  ;;  %v1642_v15 = vld [vmem:[%s3720_s1 + $0x38] sm:$0xf0]  ;;  %v1616_v17 = vld [vmem:[%s3720_s1] sm:$0xf]  ;;  %v1637_v18 = vor.u32 %v2386_v9, %v1634_v11  ;;  %v1641_v19 = vor.u32 %v2389_v13, %v1640_v12 }
  0x14   :  { %234 = vmatpush.bf16.msra.mxu0 %v1665_v56  ;;  %v2384_v20 = vld [vmem:[%s3720_s1 + $0xc] sm:$0xf0]  ;;  %v2382_v21 = vld [vmem:[%s3720_s1 + $0x4] sm:$0xf]  ;;  %v1618_v22 = vld [vmem:[%s3720_s1 + $0x10] sm:$0xf0]  ;;  %v1645_v23 = vor.u32 %v2387_v14, %v1642_v15 }
  0x15   :  { %247 = vmatpush.bf16.msra.mxu1 %v1669_v57  ;;  %260 = vmatpush.bf16.msra.mxu2 %v1673_v58  ;;  %v1624_v24 = vld [vmem:[%s3720_s1 + $0x8] sm:$0xf]  ;;  %v2385_v25 = vld [vmem:[%s3720_s1 + $0x14] sm:$0xf0]  ;;  %v2383_v26 = vld [vmem:[%s3720_s1 + $0xc] sm:$0xf]  ;;  %v1617_v30 = vor.u32 %v2384_v20, %v1616_v17  ;;  %v1621_v34 = vor.u32 %v2382_v21, %v1618_v22 }
  0x16   :  { %273 = vmatpush.bf16.msra.mxu3 %v1677_v62  ;;  %v1626_v27 = vld [vmem:[%s3720_s1 + $0x18] sm:$0xf0]  ;;  %v1856_v28 = vld [vmem:[%s3721_s3 + $0xe0] sm:$0xf]  ;;  %v2444_v29 = vld [vmem:[%s3721_s3 + $0xec] sm:$0xf0]  ;;  %v1625_v35 = vor.u32 %v2385_v25, %v1624_v24 }
  0x17   :  { %v26_v31 = vld [vmem:[%s3722_s0] sm:$0xff]  ;;  %v2476_v33 = vld [vmem:[%s3721_s3 + $0x1ec] sm:$0xf0]  ;;  %v1629_v36 = vor.u32 %v2383_v26, %v1626_v27  ;;  %v1857_v37 = vor.u32 %v2444_v29, %v1856_v28 }
  0x18   :  { %235 = vmatpush.bf16.msra.mxu0 %v1649_v4  ;;  %v1984_v32 = vld [vmem:[%s3721_s3 + $0x1e0] sm:$0xf]  ;;  %v2508_v40 = vld [vmem:[%s3721_s3 + $0x2ec] sm:$0xf0]  ;;  %v27_v41 = vpack.c.bf16 %v26_v31, %v26_v31 }
  0x19   :  { %248 = vmatpush.bf16.msra.mxu1 %v1653_v5  ;;  %261 = vmatpush.bf16.msra.mxu2 %v1657_v6  ;;  %v1840_v38 = vld [vmem:[%s3721_s3 + $0xc0] sm:$0xf]  ;;  %v1985_v42 = vor.u32 %v2476_v33, %v1984_v32  ;;  %v2440_v43 = vld [vmem:[%s3721_s3 + $0xcc] sm:$0xf0] }
  0x1a   :  { %274 = vmatpush.bf16.msra.mxu3 %v1661_v10  ;;  %v2112_v39 = vld [vmem:[%s3721_s3 + $0x2e0] sm:$0xf]  ;;  %v2540_v45 = vld [vmem:[%s3721_s3 + $0x3ec] sm:$0xf0]  ;;  %v1841_v49 = vor.u32 %v2440_v43, %v1840_v38 }
  0x1b   :  { %v2240_v44 = vld [vmem:[%s3721_s3 + $0x3e0] sm:$0xf]  ;;  %v2472_v47 = vld [vmem:[%s3721_s3 + $0x1cc] sm:$0xf0]  ;;  %v2113_v48 = vor.u32 %v2508_v40, %v2112_v39 }
  0x1c   :  { %236 = vmatpush.bf16.msra.mxu0 %v1633_v16  ;;  %v1968_v46 = vld [vmem:[%s3721_s3 + $0x1c0] sm:$0xf]  ;;  %v2241_v50 = vor.u32 %v2540_v45, %v2240_v44  ;;  %v2504_v53 = vld [vmem:[%s3721_s3 + $0x2cc] sm:$0xf0] }
  0x1d   :  { %249 = vmatpush.bf16.msra.mxu1 %v1637_v18  ;;  %262 = vmatpush.bf16.msra.mxu2 %v1641_v19  ;;  %v1824_v51 = vld [vmem:[%s3721_s3 + $0xa0] sm:$0xf]  ;;  %v1969_v54 = vor.u32 %v2472_v47, %v1968_v46  ;;  %v2436_v55 = vld [vmem:[%s3721_s3 + $0xac] sm:$0xf0] }
  0x1e   :  { %275 = vmatpush.bf16.msra.mxu3 %v1645_v23  ;;  %v2096_v52 = vld [vmem:[%s3721_s3 + $0x2c0] sm:$0xf]  ;;  %v2536_v57 = vld [vmem:[%s3721_s3 + $0x3cc] sm:$0xf0]  ;;  %v1825_v61 = vor.u32 %v2436_v55, %v1824_v51 }
  0x1f   :  { %v2224_v56 = vld [vmem:[%s3721_s3 + $0x3c0] sm:$0xf]  ;;  %v2468_v59 = vld [vmem:[%s3721_s3 + $0x1ac] sm:$0xf0]  ;;  %v2097_v60 = vor.u32 %v2504_v53, %v2096_v52 }
  0x20   :  { %237 = vmatpush.bf16.msra.mxu0 %v1617_v30  ;;  %v1952_v58 = vld [vmem:[%s3721_s3 + $0x1a0] sm:$0xf]  ;;  %v2225_v62 = vor.u32 %v2536_v57, %v2224_v56  ;;  %v2500_v1 = vld [vmem:[%s3721_s3 + $0x2ac] sm:$0xf0]  ;;  %v2442_v56 = vld [vmem:[%s3721_s3 + $0xe4] sm:$0xf] }
  0x21   :  { %250 = vmatpush.bf16.msra.mxu1 %v1621_v34  ;;  %263 = vmatpush.bf16.msra.mxu2 %v1625_v35  ;;  %v1808_v63 = vld [vmem:[%s3721_s3 + $0x80] sm:$0xf]  ;;  %v1953_v2 = vor.u32 %v2468_v59, %v1952_v58  ;;  %v2432_v3 = vld [vmem:[%s3721_s3 + $0x8c] sm:$0xf0]  ;;  %v1858_v57 = vld [vmem:[%s3721_s3 + $0xf0] sm:$0xf0] }
  0x22   :  { %276 = vmatpush.bf16.msra.mxu3 %v1629_v36  ;;  %v2080_v0 = vld [vmem:[%s3721_s3 + $0x2a0] sm:$0xf]  ;;  %v2532_v5 = vld [vmem:[%s3721_s3 + $0x3ac] sm:$0xf0]  ;;  %v1809_v9 = vor.u32 %v2432_v3, %v1808_v63  ;;  %v2474_v58 = vld [vmem:[%s3721_s3 + $0x1e4] sm:$0xf] }
  0x23   :  { %238 = vmatmul.bf16.vlgmr.msra.gmra.mxu0 %v27_v41  ;;  %v2208_v4 = vld [vmem:[%s3721_s3 + $0x3a0] sm:$0xf]  ;;  %v2464_v7 = vld [vmem:[%s3721_s3 + $0x18c] sm:$0xf0]  ;;  %v2081_v8 = vor.u32 %v2500_v1, %v2080_v0  ;;  %v1986_v59 = vld [vmem:[%s3721_s3 + $0x1f0] sm:$0xf0] }
  0x24   :  { %1068 = vmatpush.bf16.msrb.mxu0 %v1857_v37  ;;  %251 = vmatmul.bf16.vlgmr.msra.gmra.mxu1 %v27_v41  ;;  %v1936_v6 = vld [vmem:[%s3721_s3 + $0x180] sm:$0xf]  ;;  %v2209_v10 = vor.u32 %v2532_v5, %v2208_v4  ;;  %v2496_v13 = vld [vmem:[%s3721_s3 + $0x28c] sm:$0xf0]  ;;  %v2438_v63 = vld [vmem:[%s3721_s3 + $0xc4] sm:$0xf]  ;;  %v1861_v4 = vor.u32 %v2442_v56, %v1858_v57 }
  0x25   :  { %1081 = vmatpush.bf16.msrb.mxu1 %v1985_v42  ;;  %264 = vmatmul.bf16.vlgmr.msra.gmra.mxu2 %v27_v41  ;;  %v1792_v11 = vld [vmem:[%s3721_s3 + $0x60] sm:$0xf]  ;;  %v1937_v14 = vor.u32 %v2464_v7, %v1936_v6  ;;  %v2428_v15 = vld [vmem:[%s3721_s3 + $0x6c] sm:$0xf0]  ;;  %v2506_v6 = vld [vmem:[%s3721_s3 + $0x2e4] sm:$0xf] }
  0x26   :  { %277 = vmatmul.bf16.vlgmr.msra.gmra.mxu3 %v27_v41  ;;  %1094 = vmatpush.bf16.msrb.mxu2 %v2113_v48  ;;  %v2064_v12 = vld [vmem:[%s3721_s3 + $0x280] sm:$0xf]  ;;  %v2528_v17 = vld [vmem:[%s3721_s3 + $0x38c] sm:$0xf0]  ;;  %v1793_v21 = vor.u32 %v2428_v15, %v1792_v11  ;;  %v2114_v7 = vld [vmem:[%s3721_s3 + $0x2f0] sm:$0xf0] }
  0x27   :  { %1107 = vmatpush.bf16.msrb.mxu3 %v2241_v50  ;;  %v2192_v16 = vld [vmem:[%s3721_s3 + $0x380] sm:$0xf]  ;;  %v2460_v19 = vld [vmem:[%s3721_s3 + $0x16c] sm:$0xf0]  ;;  %v2065_v20 = vor.u32 %v2496_v13, %v2064_v12  ;;  %v2242_v11 = vld [vmem:[%s3721_s3 + $0x3f0] sm:$0xf0] }
  0x28   :  { %1069 = vmatpush.bf16.msrb.mxu0 %v1841_v49  ;;  %v1920_v18 = vld [vmem:[%s3721_s3 + $0x160] sm:$0xf]  ;;  %v2193_v22 = vor.u32 %v2528_v17, %v2192_v16  ;;  %v2492_v25 = vld [vmem:[%s3721_s3 + $0x26c] sm:$0xf0]  ;;  %v2470_v12 = vld [vmem:[%s3721_s3 + $0x1c4] sm:$0xf]  ;;  %v2117_v16 = vor.u32 %v2506_v6, %v2114_v7 }
  0x29   :  { %1082 = vmatpush.bf16.msrb.mxu1 %v1969_v54  ;;  %v1776_v23 = vld [vmem:[%s3721_s3 + $0x40] sm:$0xf]  ;;  %v1921_v26 = vor.u32 %v2460_v19, %v1920_v18  ;;  %v2424_v27 = vld [vmem:[%s3721_s3 + $0x4c] sm:$0xf0]  ;;  %v1970_v13 = vld [vmem:[%s3721_s3 + $0x1d0] sm:$0xf0] }
  0x2a   :  { %1095 = vmatpush.bf16.msrb.mxu2 %v2097_v60  ;;  %v2048_v24 = vld [vmem:[%s3721_s3 + $0x260] sm:$0xf]  ;;  %v2524_v29 = vld [vmem:[%s3721_s3 + $0x36c] sm:$0xf0]  ;;  %v1777_v33 = vor.u32 %v2424_v27, %v1776_v23  ;;  %v2434_v19 = vld [vmem:[%s3721_s3 + $0xa4] sm:$0xf] }
  0x2b   :  { %1108 = vmatpush.bf16.msrb.mxu3 %v2225_v62  ;;  %v2176_v28 = vld [vmem:[%s3721_s3 + $0x360] sm:$0xf]  ;;  %v2456_v31 = vld [vmem:[%s3721_s3 + $0x14c] sm:$0xf0]  ;;  %v2049_v32 = vor.u32 %v2492_v25, %v2048_v24  ;;  %v1826_v23 = vld [vmem:[%s3721_s3 + $0xb0] sm:$0xf0] }
  0x2c   :  { %1070 = vmatpush.bf16.msrb.mxu0 %v1825_v61  ;;  %v1904_v30 = vld [vmem:[%s3721_s3 + $0x140] sm:$0xf]  ;;  %v2177_v34 = vor.u32 %v2524_v29, %v2176_v28  ;;  %v2488_v37 = vld [vmem:[%s3721_s3 + $0x24c] sm:$0xf0]  ;;  %v2534_v24 = vld [vmem:[%s3721_s3 + $0x3c4] sm:$0xf]  ;;  %v1829_v29 = vor.u32 %v2434_v19, %v1826_v23 }
  0x2d   :  { %1083 = vmatpush.bf16.msrb.mxu1 %v1953_v2  ;;  %v1760_v35 = vld [vmem:[%s3721_s3 + $0x20] sm:$0xf]  ;;  %v1905_v38 = vor.u32 %v2456_v31, %v1904_v30  ;;  %v2420_v39 = vld [vmem:[%s3721_s3 + $0x2c] sm:$0xf0]  ;;  %v2226_v25 = vld [vmem:[%s3721_s3 + $0x3d0] sm:$0xf0] }
  0x2e   :  { %1096 = vmatpush.bf16.msrb.mxu2 %v2081_v8  ;;  %v2032_v36 = vld [vmem:[%s3721_s3 + $0x240] sm:$0xf]  ;;  %v2520_v41 = vld [vmem:[%s3721_s3 + $0x34c] sm:$0xf0]  ;;  %v1761_v46 = vor.u32 %v2420_v39, %v1760_v35  ;;  %v1989_v8 = vor.u32 %v2474_v58, %v1986_v59  ;;  %v1954_v27 = vld [vmem:[%s3721_s3 + $0x1b0] sm:$0xf0]  ;;  %v2229_v30 = vor.u32 %v2534_v24, %v2226_v25 }
  0x2f   :  { %1109 = vmatpush.bf16.msrb.mxu3 %v2209_v10  ;;  %v2160_v40 = vld [vmem:[%s3721_s3 + $0x340] sm:$0xf]  ;;  %v2452_v43 = vld [vmem:[%s3721_s3 + $0x12c] sm:$0xf0]  ;;  %v2033_v44 = vor.u32 %v2488_v37, %v2032_v36  ;;  %v2538_v10 = vld [vmem:[%s3721_s3 + $0x3e4] sm:$0xf] }
  0x30   :  { %1071 = vmatpush.bf16.msrb.mxu0 %v1809_v9  ;;  %v1888_v42 = vld [vmem:[%s3721_s3 + $0x120] sm:$0xf]  ;;  %v2161_v47 = vor.u32 %v2520_v41, %v2160_v40  ;;  %v2416_v48 = vld [vmem:[%s3721_s3 + $0xc] sm:$0xf0]  ;;  %v1842_v9 = vld [vmem:[%s3721_s3 + $0xd0] sm:$0xf0]  ;;  %v2245_v18 = vor.u32 %v2538_v10, %v2242_v11 }
  0x31   :  { %1084 = vmatpush.bf16.msrb.mxu1 %v1937_v14  ;;  %v1744_v45 = vld [vmem:[%s3721_s3] sm:$0xf]  ;;  %v2484_v50 = vld [vmem:[%s3721_s3 + $0x22c] sm:$0xf0]  ;;  %v1889_v51 = vor.u32 %v2452_v43, %v1888_v42  ;;  %v1845_v17 = vor.u32 %v2438_v63, %v1842_v9  ;;  %v2430_v31 = vld [vmem:[%s3721_s3 + $0x84] sm:$0xf] }
  0x32   :  { %1097 = vmatpush.bf16.msrb.mxu2 %v2065_v20  ;;  %v2016_v49 = vld [vmem:[%s3721_s3 + $0x220] sm:$0xf]  ;;  %v2516_v54 = vld [vmem:[%s3721_s3 + $0x32c] sm:$0xf0]  ;;  %v1745_v61 = vor.u32 %v2416_v48, %v1744_v45  ;;  %v2502_v20 = vld [vmem:[%s3721_s3 + $0x2c4] sm:$0xf] }
  0x33   :  { %1110 = vmatpush.bf16.msrb.mxu3 %v2193_v22  ;;  %v1872_v52 = vld [vmem:[%s3721_s3 + $0x100] sm:$0xf]  ;;  %v2448_v55 = vld [vmem:[%s3721_s3 + $0x10c] sm:$0xf0]  ;;  %v2017_v60 = vor.u32 %v2484_v50, %v2016_v49  ;;  %v1973_v22 = vor.u32 %v2470_v12, %v1970_v13  ;;  %v1810_v35 = vld [vmem:[%s3721_s3 + $0x90] sm:$0xf0] }
  0x34   :  { %1072 = vmatpush.bf16.msrb.mxu0 %v1793_v21  ;;  %v2144_v53 = vld [vmem:[%s3721_s3 + $0x320] sm:$0xf]  ;;  %v2480_v1 = vld [vmem:[%s3721_s3 + $0x20c] sm:$0xf0]  ;;  %v1873_v3 = vor.u32 %v2448_v55, %v1872_v52  ;;  %v2098_v21 = vld [vmem:[%s3721_s3 + $0x2d0] sm:$0xf0]  ;;  %v1813_v41 = vor.u32 %v2430_v31, %v1810_v35 }
  0x35   :  { %1085 = vmatpush.bf16.msrb.mxu1 %v1921_v26  ;;  %v2145_v62 = vor.u32 %v2516_v54, %v2144_v53  ;;  %v2000_v0 = vld [vmem:[%s3721_s3 + $0x200] sm:$0xf]  ;;  %v2512_v5 = vld [vmem:[%s3721_s3 + $0x30c] sm:$0xf0]  ;;  %v2466_v26 = vld [vmem:[%s3721_s3 + $0x1a4] sm:$0xf]  ;;  %v2101_v28 = vor.u32 %v2502_v20, %v2098_v21 }
  0x36   :  { %1098 = vmatpush.bf16.msrb.mxu2 %v2049_v32  ;;  %v2128_v2 = vld [vmem:[%s3721_s3 + $0x300] sm:$0xf]  ;;  %v2001_v14 = vor.u32 %v2480_v1, %v2000_v0  ;;  %v2498_v32 = vld [vmem:[%s3721_s3 + $0x2a4] sm:$0xf]  ;;  %v2210_v37 = vld [vmem:[%s3721_s3 + $0x3b0] sm:$0xf0] }
  0x37   :  { %1111 = vmatpush.bf16.msrb.mxu3 %v2177_v34  ;;  %v2129_v15 = vor.u32 %v2512_v5, %v2128_v2  ;;  %v1957_v34 = vor.u32 %v2466_v26, %v1954_v27  ;;  %v2530_v36 = vld [vmem:[%s3721_s3 + $0x3a4] sm:$0xf]  ;;  %v1938_v39 = vld [vmem:[%s3721_s3 + $0x190] sm:$0xf0] }
  0x38   :  { %1073 = vmatpush.bf16.msrb.mxu0 %v1777_v33  ;;  %v2082_v33 = vld [vmem:[%s3721_s3 + $0x2b0] sm:$0xf0]  ;;  %v2213_v42 = vor.u32 %v2530_v36, %v2210_v37  ;;  %v2426_v43 = vld [vmem:[%s3721_s3 + $0x64] sm:$0xf] }
  0x39   :  { %1086 = vmatpush.bf16.msrb.mxu1 %v1905_v38  ;;  %v2462_v38 = vld [vmem:[%s3721_s3 + $0x184] sm:$0xf]  ;;  %v2085_v40 = vor.u32 %v2498_v32, %v2082_v33  ;;  %v2066_v45 = vld [vmem:[%s3721_s3 + $0x290] sm:$0xf0] }
  0x3a   :  { %1099 = vmatpush.bf16.msrb.mxu2 %v2033_v44  ;;  %v2494_v44 = vld [vmem:[%s3721_s3 + $0x284] sm:$0xf]  ;;  %v2194_v49 = vld [vmem:[%s3721_s3 + $0x390] sm:$0xf0] }
  0x3b   :  { %1112 = vmatpush.bf16.msrb.mxu3 %v2161_v47  ;;  %v1794_v47 = vld [vmem:[%s3721_s3 + $0x70] sm:$0xf0]  ;;  %v2526_v48 = vld [vmem:[%s3721_s3 + $0x384] sm:$0xf]  ;;  %v2069_v52 = vor.u32 %v2494_v44, %v2066_v45  ;;  %v2477_v44 = vld [vmem:[%s3721_s3 + $0x1f4] sm:$0xf0] }
  0x3c   :  { %1074 = vmatpush.bf16.msrb.mxu0 %v1761_v46  ;;  %v1941_v46 = vor.u32 %v2462_v38, %v1938_v39  ;;  %v2458_v50 = vld [vmem:[%s3721_s3 + $0x164] sm:$0xf]  ;;  %v1797_v53 = vor.u32 %v2426_v43, %v1794_v47  ;;  %v2197_v54 = vor.u32 %v2526_v48, %v2194_v49  ;;  %v1778_v57 = vld [vmem:[%s3721_s3 + $0x50] sm:$0xf0]  ;;  %v1992_v43 = vld [vmem:[%s3721_s3 + $0x1e8] sm:$0xf] }
  0x3d   :  { %1087 = vmatpush.bf16.msrb.mxu1 %v1889_v51  ;;  %v1922_v51 = vld [vmem:[%s3721_s3 + $0x170] sm:$0xf0]  ;;  %v2422_v56 = vld [vmem:[%s3721_s3 + $0x44] sm:$0xf] }
  0x3e   :  { %1100 = vmatpush.bf16.msrb.mxu2 %v2017_v60  ;;  %v1925_v55 = vor.u32 %v2458_v50, %v1922_v51  ;;  %v2454_v58 = vld [vmem:[%s3721_s3 + $0x144] sm:$0xf]  ;;  %v1906_v59 = vld [vmem:[%s3721_s3 + $0x150] sm:$0xf0]  ;;  %v1781_v60 = vor.u32 %v2422_v56, %v1778_v57  ;;  %v1993_v51 = vor.u32 %v2477_v44, %v1992_v43  ;;  %v2473_v56 = vld [vmem:[%s3721_s3 + $0x1d4] sm:$0xf0] }
  0x3f   :  { %1113 = vmatpush.bf16.msrb.mxu3 %v2145_v62  ;;  %v2490_v62 = vld [vmem:[%s3721_s3 + $0x264] sm:$0xf]  ;;  %v2050_v63 = vld [vmem:[%s3721_s3 + $0x270] sm:$0xf0] }
  0x40   :  { %1075 = vmatpush.bf16.msrb.mxu0 %v1745_v61  ;;  %v1909_v61 = vor.u32 %v2454_v58, %v1906_v59  ;;  %v2522_v0 = vld [vmem:[%s3721_s3 + $0x364] sm:$0xf]  ;;  %v2053_v1 = vor.u32 %v2490_v62, %v2050_v63  ;;  %v2178_v2 = vld [vmem:[%s3721_s3 + $0x370] sm:$0xf0]  ;;  %v2120_v62 = vld [vmem:[%s3721_s3 + $0x2e8] sm:$0xf] }
  0x41   :  { %1088 = vmatpush.bf16.msrb.mxu1 %v1873_v3  ;;  %v2181_v3 = vor.u32 %v2522_v0, %v2178_v2  ;;  %v1762_v5 = vld [vmem:[%s3721_s3 + $0x30] sm:$0xf0]  ;;  %v2450_v7 = vld [vmem:[%s3721_s3 + $0x124] sm:$0xf]  ;;  %v2509_v63 = vld [vmem:[%s3721_s3 + $0x2f4] sm:$0xf0] }
  0x42   :  { %1101 = vmatpush.bf16.msrb.mxu2 %v2001_v14  ;;  %v2486_v10 = vld [vmem:[%s3721_s3 + $0x244] sm:$0xf]  ;;  %v2034_v11 = vld [vmem:[%s3721_s3 + $0x250] sm:$0xf0]  ;;  %v2248_v0 = vld [vmem:[%s3721_s3 + $0x3e8] sm:$0xf] }
  0x43   :  { %1114 = vmatpush.bf16.msrb.mxu3 %v2129_v15  ;;  %v2518_v12 = vld [vmem:[%s3721_s3 + $0x344] sm:$0xf]  ;;  %v2037_v13 = vor.u32 %v2486_v10, %v2034_v11  ;;  %v2162_v14 = vld [vmem:[%s3721_s3 + $0x350] sm:$0xf0]  ;;  %v2121_v11 = vor.u32 %v2509_v63, %v2120_v62  ;;  %v2421_v62 = vld [vmem:[%s3721_s3 + $0x34] sm:$0xf0] }
  0x44   :  { %1120 = vmatpush.bf16.msra.mxu0 %v1861_v4  ;;  %v2418_v4 = vld [vmem:[%s3721_s3 + $0x24] sm:$0xf]  ;;  %v2165_v15 = vor.u32 %v2518_v12, %v2162_v14  ;;  %v1874_v20 = vld [vmem:[%s3721_s3 + $0x110] sm:$0xf0]  ;;  %v1896_v63 = vld [vmem:[%s3721_s3 + $0x128] sm:$0xf] }
  0x45   :  { %1133 = vmatpush.bf16.msra.mxu1 %v1989_v8  ;;  %v1765_v6 = vor.u32 %v2418_v4, %v1762_v5  ;;  %v1890_v8 = vld [vmem:[%s3721_s3 + $0x130] sm:$0xf0]  ;;  %v2514_v25 = vld [vmem:[%s3721_s3 + $0x324] sm:$0xf]  ;;  %v2541_v4 = vld [vmem:[%s3721_s3 + $0x3f4] sm:$0xf0] }
  0x46   :  { %1146 = vmatpush.bf16.msra.mxu2 %v2117_v16  ;;  %v1893_v9 = vor.u32 %v2450_v7, %v1890_v8  ;;  %v2414_v16 = vld [vmem:[%s3721_s3 + $0x4] sm:$0xf]  ;;  %v2018_v23 = vld [vmem:[%s3721_s3 + $0x230] sm:$0xf0]  ;;  %v1832_v5 = vld [vmem:[%s3721_s3 + $0xa8] sm:$0xf] }
  0x47   :  { %1159 = vmatpush.bf16.msra.mxu3 %v2245_v18  ;;  %v2446_v18 = vld [vmem:[%s3721_s3 + $0x104] sm:$0xf]  ;;  %v2146_v26 = vld [vmem:[%s3721_s3 + $0x330] sm:$0xf0]  ;;  %v1960_v8 = vld [vmem:[%s3721_s3 + $0x1a8] sm:$0xf] }
  0x48   :  { %1121 = vmatpush.bf16.msra.mxu0 %v1845_v17  ;;  %v1746_v17 = vld [vmem:[%s3721_s3 + $0x10] sm:$0xf0]  ;;  %v1877_v21 = vor.u32 %v2446_v18, %v1874_v20  ;;  %v2149_v27 = vor.u32 %v2514_v25, %v2146_v26  ;;  %v2510_v31 = vld [vmem:[%s3721_s3 + $0x304] sm:$0xf]  ;;  %v2537_v20 = vld [vmem:[%s3721_s3 + $0x3d4] sm:$0xf0] }
  0x49   :  { %1134 = vmatpush.bf16.msra.mxu1 %v1973_v22  ;;  %v1749_v19 = vor.u32 %v2414_v16, %v1746_v17  ;;  %v2482_v22 = vld [vmem:[%s3721_s3 + $0x224] sm:$0xf]  ;;  %v2130_v32 = vld [vmem:[%s3721_s3 + $0x310] sm:$0xf0]  ;;  %v2505_v16 = vld [vmem:[%s3721_s3 + $0x2d4] sm:$0xf0] }
  0x4a   :  { %1147 = vmatpush.bf16.msra.mxu2 %v2101_v28  ;;  %v2021_v24 = vor.u32 %v2482_v22, %v2018_v23  ;;  %v2478_v28 = vld [vmem:[%s3721_s3 + $0x204] sm:$0xf]  ;;  %v2133_v33 = vor.u32 %v2510_v31, %v2130_v32  ;;  %v2232_v17 = vld [vmem:[%s3721_s3 + $0x3c8] sm:$0xf]  ;;  %v2433_v22 = vld [vmem:[%s3721_s3 + $0x94] sm:$0xf0] }
  0x4b   :  { %1160 = vmatpush.bf16.msra.mxu3 %v2229_v30  ;;  %v1944_v23 = vld [vmem:[%s3721_s3 + $0x188] sm:$0xf]  ;;  %v2501_v31 = vld [vmem:[%s3721_s3 + $0x2b4] sm:$0xf0] }
  0x4c   :  { %1122 = vmatpush.bf16.msra.mxu0 %v1829_v29  ;;  %v2002_v29 = vld [vmem:[%s3721_s3 + $0x210] sm:$0xf0] }
  0x4d   :  { %1135 = vmatpush.bf16.msra.mxu1 %v1957_v34  ;;  %v2005_v30 = vor.u32 %v2478_v28, %v2002_v29  ;;  %v60_v34 = vld [vmem:[%s3723_s2] sm:$0xf]  ;;  %v2233_v28 = vor.u32 %v2537_v20, %v2232_v17  ;;  %v2475_v17 = vld [vmem:[%s3721_s3 + $0x1ec] sm:$0xf] }
  0x4e   :  { %1148 = vmatpush.bf16.msra.mxu2 %v2085_v40  ;;  %v62_v35 = vperm.slane %v60_v34, 0  ;;  %v63_v36 = vperm.slane %v60_v34, 1  ;;  %v1864_v40 = vld [vmem:[%s3721_s3 + $0xe8] sm:$0xf]  ;;  %v64_v47 = vperm.slane %v60_v34, 2  ;;  %v65_v50 = vperm.slane %v60_v34, 3 }
  0x4f   :  { %1161 = vmatpush.bf16.msra.mxu3 %v2213_v42  ;;  %v2533_v34 = vld [vmem:[%s3721_s3 + $0x3b4] sm:$0xf0] }
  0x50   :  { %1123 = vmatpush.bf16.msra.mxu0 %v1813_v41  ;;  %v2445_v41 = vld [vmem:[%s3721_s3 + $0xf4] sm:$0xf0] }
  0x51   :  { %1136 = vmatpush.bf16.msra.mxu1 %v1941_v46  ;;  %v1865_v48 = vor.u32 %v2445_v41, %v1864_v40  ;;  %v2072_v41 = vld [vmem:[%s3721_s3 + $0x288] sm:$0xf] }
  0x52   :  { %1149 = vmatpush.bf16.msra.mxu2 %v2069_v52  ;;  %v1848_v52 = vld [vmem:[%s3721_s3 + $0xc8] sm:$0xf] }
  0x53   :  { %1162 = vmatpush.bf16.msra.mxu3 %v2197_v54 }
  0x54   :  { %1124 = vmatpush.bf16.msra.mxu0 %v1797_v53  ;;  %v2441_v53 = vld [vmem:[%s3721_s3 + $0xd4] sm:$0xf0] }
  0x55   :  { %1137 = vmatpush.bf16.msra.mxu1 %v1925_v55  ;;  %v1976_v55 = vld [vmem:[%s3721_s3 + $0x1c8] sm:$0xf] }
  0x56   :  { %1150 = vmatpush.bf16.msra.mxu2 %v2053_v1 }
  0x57   :  { %1163 = vmatpush.bf16.msra.mxu3 %v2181_v3  ;;  %v1977_v3 = vor.u32 %v2473_v56, %v1976_v55  ;;  %v2056_v55 = vld [vmem:[%s3721_s3 + $0x268] sm:$0xf]  ;;  %v2493_v56 = vld [vmem:[%s3721_s3 + $0x274] sm:$0xf0] }
  0x58   :  { %1125 = vmatpush.bf16.msra.mxu0 %v1781_v60 }
  0x59   :  { %1138 = vmatpush.bf16.msra.mxu1 %v1909_v61  ;;  %v1849_v61 = vor.u32 %v2441_v53, %v1848_v52 }
  0x5a   :  { %1151 = vmatpush.bf16.msra.mxu2 %v2037_v13  ;;  %v2249_v13 = vor.u32 %v2541_v4, %v2248_v0  ;;  %v2453_v0 = vld [vmem:[%s3721_s3 + $0x134] sm:$0xf0] }
  0x5b   :  { %1164 = vmatpush.bf16.msra.mxu3 %v2165_v15  ;;  %v2104_v15 = vld [vmem:[%s3721_s3 + $0x2c8] sm:$0xf]  ;;  %v2489_v4 = vld [vmem:[%s3721_s3 + $0x254] sm:$0xf0] }
  0x5c   :  { %1126 = vmatpush.bf16.msra.mxu0 %v1765_v6  ;;  %v2437_v6 = vld [vmem:[%s3721_s3 + $0xb4] sm:$0xf0]  ;;  %v2105_v26 = vor.u32 %v2505_v16, %v2104_v15  ;;  %v1866_v16 = vld [vmem:[%s3721_s3 + $0xf8] sm:$0xf0] }
  0x5d   :  { %1139 = vmatpush.bf16.msra.mxu1 %v1893_v9  ;;  %v2469_v9 = vld [vmem:[%s3721_s3 + $0x1b4] sm:$0xf0]  ;;  %v1833_v14 = vor.u32 %v2437_v6, %v1832_v5  ;;  %v2168_v5 = vld [vmem:[%s3721_s3 + $0x348] sm:$0xf] }
  0x5e   :  { %1152 = vmatpush.bf16.msra.mxu2 %v2021_v24  ;;  %v2465_v24 = vld [vmem:[%s3721_s3 + $0x194] sm:$0xf0] }
  0x5f   :  { %1165 = vmatpush.bf16.msra.mxu3 %v2149_v27  ;;  %v1945_v32 = vor.u32 %v2465_v24, %v1944_v23 }
  0x60   :  { %1127 = vmatpush.bf16.msra.mxu0 %v1749_v19  ;;  %v1961_v19 = vor.u32 %v2469_v9, %v1960_v8  ;;  %v2521_v8 = vld [vmem:[%s3721_s3 + $0x354] sm:$0xf0]  ;;  %v1752_v9 = vld [vmem:[%s3721_s3 + $0x8] sm:$0xf] }
  0x61   :  { %1140 = vmatpush.bf16.msra.mxu1 %v1877_v21  ;;  %v1816_v21 = vld [vmem:[%s3721_s3 + $0x88] sm:$0xf]  ;;  %v2169_v20 = vor.u32 %v2521_v8, %v2168_v5  ;;  %v2218_v8 = vld [vmem:[%s3721_s3 + $0x3b8] sm:$0xf0] }
  0x62   :  { %1153 = vmatpush.bf16.msra.mxu2 %v2005_v30  ;;  %v1817_v29 = vor.u32 %v2433_v22, %v1816_v21  ;;  %v2088_v30 = vld [vmem:[%s3721_s3 + $0x2a8] sm:$0xf]  ;;  %v2485_v22 = vld [vmem:[%s3721_s3 + $0x234] sm:$0xf0] }
  0x63   :  { %1166 = vmatpush.bf16.msra.mxu3 %v2133_v33  ;;  %v2216_v33 = vld [vmem:[%s3721_s3 + $0x3a8] sm:$0xf] }
  0x64   :  { %v2217_v40 = vor.u32 %v2533_v34, %v2216_v33  ;;  %v2024_v21 = vld [vmem:[%s3721_s3 + $0x228] sm:$0xf]  ;;  %v1978_v33 = vld [vmem:[%s3721_s3 + $0x1d8] sm:$0xf0] }
  0xa0   :  { %v239_v37 = vpop.f32.mrf.mxu0 }
  0xa1   :  { %v240_v38 = vadd.f32 %v239_v37, %v62_v35  ;;  %v252_v39 = vpop.f32.mrf.mxu1  ;;  %v1800_v35 = vld [vmem:[%s3721_s3 + $0x68] sm:$0xf] }
  0xa2   :  { %v253_v42 = vadd.f32 %v252_v39, %v63_v36  ;;  %v2429_v36 = vld [vmem:[%s3721_s3 + $0x74] sm:$0xf0]  ;;  %v1928_v37 = vld [vmem:[%s3721_s3 + $0x168] sm:$0xf]  ;;  %v2089_v39 = vor.u32 %v2501_v31, %v2088_v30  ;;  %v2025_v30 = vor.u32 %v2485_v22, %v2024_v21  ;;  %v1850_v31 = vld [vmem:[%s3721_s3 + $0xd8] sm:$0xf0] }
  0xa3   :  { %v282_v45 = vmax.f32 %v240_v38, 0.0  ;;  %v2461_v38 = vld [vmem:[%s3721_s3 + $0x174] sm:$0xf0]  ;;  %v1801_v43 = vor.u32 %v2429_v36, %v1800_v35  ;;  %v2008_v35 = vld [vmem:[%s3721_s3 + $0x208] sm:$0xf] }
  0xa4   :  { %v283_v46 = vmax.f32 %v253_v42, 0.0  ;;  %v2497_v42 = vld [vmem:[%s3721_s3 + $0x294] sm:$0xf0]  ;;  %v1929_v44 = vor.u32 %v2461_v38, %v1928_v37  ;;  %v2136_v37 = vld [vmem:[%s3721_s3 + $0x308] sm:$0xf] }
  0xa5   :  { %v3213_v49 = vpack.c.bf16 %v282_v45, %v282_v45  ;;  %v2200_v45 = vld [vmem:[%s3721_s3 + $0x388] sm:$0xf]  ;;  %v2073_v52 = vor.u32 %v2497_v42, %v2072_v41  ;;  %v2481_v36 = vld [vmem:[%s3721_s3 + $0x214] sm:$0xf0]  ;;  %v2527_v21 = vld [vmem:[%s3721_s3 + $0x38c] sm:$0xf] }
  0xa6   :  { %v3221_v54 = vpack.c.bf16 %v283_v46, %v283_v46  ;;  %v2529_v46 = vld [vmem:[%s3721_s3 + $0x394] sm:$0xf0]  ;;  %v2202_v22 = vld [vmem:[%s3721_s3 + $0x398] sm:$0xf0] }
  0xa7   :  { %1076 = vmatmul.bf16.vlgmr.msrb.gmra.mxu0 %v3213_v49  ;;  %v2201_v53 = vor.u32 %v2529_v46, %v2200_v45  ;;  %v2513_v38 = vld [vmem:[%s3721_s3 + $0x314] sm:$0xf0]  ;;  %v2435_v45 = vld [vmem:[%s3721_s3 + $0xac] sm:$0xf]  ;;  %v2009_v46 = vor.u32 %v2481_v36, %v2008_v35  ;;  %v1770_v36 = vld [vmem:[%s3721_s3 + $0x38] sm:$0xf0] }
  0xa8   :  { %v265_v57 = vpop.f32.mrf.mxu2  ;;  %1089 = vmatmul.bf16.vlgmr.msrb.gmra.mxu1 %v3221_v54  ;;  %1172 = vmatpush.bf16.msrb.mxu0 %v1865_v48  ;;  %v241_v60 = vpop.f32.mrf.mxu0  ;;  %v2425_v48 = vld [vmem:[%s3721_s3 + $0x54] sm:$0xf0]  ;;  %v2419_v35 = vld [vmem:[%s3721_s3 + $0x2c] sm:$0xf] }
  0xa9   :  { %v266_v58 = vadd.f32 %v265_v57, %v64_v47  ;;  %v278_v59 = vpop.f32.mrf.mxu3  ;;  %1185 = vmatpush.bf16.msrb.mxu1 %v1993_v51  ;;  %v254_v2 = vpop.f32.mrf.mxu1  ;;  %v1784_v47 = vld [vmem:[%s3721_s3 + $0x48] sm:$0xf]  ;;  %v2457_v51 = vld [vmem:[%s3721_s3 + $0x154] sm:$0xf0] }
  0xaa   :  { %v279_v1 = vadd.f32 %v278_v59, %v65_v50  ;;  %v1912_v50 = vld [vmem:[%s3721_s3 + $0x148] sm:$0xf]  ;;  %v1785_v57 = vor.u32 %v2425_v48, %v1784_v47  ;;  %v2525_v60 = vld [vmem:[%s3721_s3 + $0x374] sm:$0xf0]  ;;  %v1834_v47 = vld [vmem:[%s3721_s3 + $0xb8] sm:$0xf0] }
  0xab   :  { %v284_v7 = vmax.f32 %v266_v58, 0.0  ;;  %v1913_v58 = vor.u32 %v2457_v51, %v1912_v50  ;;  %v2184_v59 = vld [vmem:[%s3721_s3 + $0x368] sm:$0xf]  ;;  %v2467_v48 = vld [vmem:[%s3721_s3 + $0x1ac] sm:$0xf]  ;;  %v2137_v51 = vor.u32 %v2513_v38, %v2136_v37 }
  0xac   :  { %v285_v10 = vmax.f32 %v279_v1, 0.0  ;;  %1173 = vmatpush.bf16.msrb.mxu0 %v1849_v61  ;;  %v1768_v61 = vld [vmem:[%s3721_s3 + $0x28] sm:$0xf]  ;;  %v2057_v1 = vor.u32 %v2493_v56, %v2056_v55  ;;  %v2185_v2 = vor.u32 %v2525_v60, %v2184_v59  ;;  %v1962_v50 = vld [vmem:[%s3721_s3 + $0x1b8] sm:$0xf0] }
  0xad   :  { %v3255_v12 = vpack.c.bf16 %v284_v7, %v284_v7  ;;  %1186 = vmatpush.bf16.msrb.mxu1 %v1977_v3  ;;  %v2040_v3 = vld [vmem:[%s3721_s3 + $0x248] sm:$0xf]  ;;  %v1769_v6 = vor.u32 %v2421_v62, %v1768_v61  ;;  %v1897_v7 = vor.u32 %v2453_v0, %v1896_v63  ;;  %v2503_v55 = vld [vmem:[%s3721_s3 + $0x2cc] sm:$0xf]  ;;  %v2106_v56 = vld [vmem:[%s3721_s3 + $0x2d8] sm:$0xf0] }
  0xae   :  { %v3266_v18 = vpack.c.bf16 %v285_v10, %v285_v10  ;;  %v2417_v10 = vld [vmem:[%s3721_s3 + $0x14] sm:$0xf0]  ;;  %v2041_v15 = vor.u32 %v2489_v4, %v2040_v3  ;;  %v2535_v59 = vld [vmem:[%s3721_s3 + $0x3cc] sm:$0xf]  ;;  %v2234_v60 = vld [vmem:[%s3721_s3 + $0x3d8] sm:$0xf0] }
  0xaf   :  { %1102 = vmatmul.bf16.vlgmr.msrb.gmra.mxu2 %v3255_v12  ;;  %v1753_v23 = vor.u32 %v2417_v10, %v1752_v9  ;;  %v2431_v61 = vld [vmem:[%s3721_s3 + $0x8c] sm:$0xf]  ;;  %v1818_v62 = vld [vmem:[%s3721_s3 + $0x98] sm:$0xf0] }
  0xb0   :  { %1115 = vmatmul.bf16.vlgmr.msrb.gmra.mxu3 %v3266_v18  ;;  %1198 = vmatpush.bf16.msrb.mxu2 %v2121_v11  ;;  %v267_v25 = vpop.f32.mrf.mxu2  ;;  %v1880_v11 = vld [vmem:[%s3721_s3 + $0x108] sm:$0xf]  ;;  %v2463_v63 = vld [vmem:[%s3721_s3 + $0x18c] sm:$0xf]  ;;  %v1946_v0 = vld [vmem:[%s3721_s3 + $0x198] sm:$0xf0]  ;;  %v1821_v5 = vor.u32 %v2431_v61, %v1818_v62 }
  0xb1   :  { %1211 = vmatpush.bf16.msrb.mxu3 %v2249_v13  ;;  %v280_v27 = vpop.f32.mrf.mxu3  ;;  %1174 = vmatpush.bf16.msrb.mxu0 %v1833_v14  ;;  %v2449_v13 = vld [vmem:[%s3721_s3 + $0x114] sm:$0xf0]  ;;  %v2443_v14 = vld [vmem:[%s3721_s3 + $0xec] sm:$0xf]  ;;  %v2152_v25 = vld [vmem:[%s3721_s3 + $0x328] sm:$0xf] }
  0xb2   :  { %1187 = vmatpush.bf16.msrb.mxu1 %v1961_v19  ;;  %v1994_v19 = vld [vmem:[%s3721_s3 + $0x1f8] sm:$0xf0]  ;;  %v1881_v24 = vor.u32 %v2449_v13, %v1880_v11  ;;  %v1869_v27 = vor.u32 %v2443_v14, %v1866_v16  ;;  %v2499_v3 = vld [vmem:[%s3721_s3 + $0x2ac] sm:$0xf] }
  0xb3   :  { %v2090_v4 = vld [vmem:[%s3721_s3 + $0x2b8] sm:$0xf0]  ;;  %v2427_v9 = vld [vmem:[%s3721_s3 + $0x6c] sm:$0xf] }
  0xb4   :  { %1199 = vmatpush.bf16.msrb.mxu2 %v2105_v26  ;;  %v2517_v26 = vld [vmem:[%s3721_s3 + $0x334] sm:$0xf0]  ;;  %v1802_v10 = vld [vmem:[%s3721_s3 + $0x78] sm:$0xf0]  ;;  %v2459_v11 = vld [vmem:[%s3721_s3 + $0x16c] sm:$0xf]  ;;  %v2093_v14 = vor.u32 %v2499_v3, %v2090_v4 }
  0xb5   :  { %1212 = vmatpush.bf16.msrb.mxu3 %v2233_v28  ;;  %1175 = vmatpush.bf16.msrb.mxu0 %v1817_v29  ;;  %v1997_v28 = vor.u32 %v2475_v17, %v1994_v19  ;;  %v2439_v29 = vld [vmem:[%s3721_s3 + $0xcc] sm:$0xf]  ;;  %v2153_v34 = vor.u32 %v2517_v26, %v2152_v25  ;;  %v1930_v13 = vld [vmem:[%s3721_s3 + $0x178] sm:$0xf0]  ;;  %v1805_v19 = vor.u32 %v2427_v9, %v1802_v10  ;;  %v2548_v4 = vld [vmem:[%s3724_s5 + $0x30] sm:$0xff] }
  0xb6   :  { %1188 = vmatpush.bf16.msrb.mxu1 %v1945_v32  ;;  %v2471_v32 = vld [vmem:[%s3721_s3 + $0x1cc] sm:$0xf]  ;;  %v1853_v41 = vor.u32 %v2439_v29, %v1850_v31  ;;  %v2074_v17 = vld [vmem:[%s3721_s3 + $0x298] sm:$0xf0] }
  0xb7   :  { %1128 = vmatmul.bf16.vlgmr.msra.gmra.mxu0 %v3213_v49  ;;  %v1981_v42 = vor.u32 %v2471_v32, %v1978_v33  ;;  %v2495_v16 = vld [vmem:[%s3721_s3 + $0x28c] sm:$0xf]  ;;  %v1914_v26 = vld [vmem:[%s3721_s3 + $0x158] sm:$0xf0] }
  0xb8   :  { %1200 = vmatpush.bf16.msrb.mxu2 %v2089_v39  ;;  %1141 = vmatmul.bf16.vlgmr.msra.gmra.mxu1 %v3221_v54  ;;  %v2507_v39 = vld [vmem:[%s3721_s3 + $0x2ec] sm:$0xf]  ;;  %v1898_v38 = vld [vmem:[%s3721_s3 + $0x138] sm:$0xf0] }
  0xb9   :  { %1213 = vmatpush.bf16.msrb.mxu3 %v2217_v40  ;;  %1176 = vmatpush.bf16.msrb.mxu0 %v1801_v43  ;;  %v2122_v40 = vld [vmem:[%s3721_s3 + $0x2f8] sm:$0xf0]  ;;  %v2539_v43 = vld [vmem:[%s3721_s3 + $0x3ec] sm:$0xf] }
  0xba   :  { %1189 = vmatpush.bf16.msrb.mxu1 %v1929_v44  ;;  %v2250_v44 = vld [vmem:[%s3721_s3 + $0x3f8] sm:$0xf0]  ;;  %v2455_v25 = vld [vmem:[%s3721_s3 + $0x14c] sm:$0xf] }
  0xbb   :  { %v2491_v29 = vld [vmem:[%s3721_s3 + $0x26c] sm:$0xf]  ;;  %v1917_v32 = vor.u32 %v2455_v25, %v1914_v26  ;;  %v2549_v61 = vld [vmem:[%s3724_s5 + $0x38] sm:$0xff]  ;;  %v2550_v25 = vld [vmem:[%s3724_s5 + $0x40] sm:$0xff] }
  0xbc   :  { %1201 = vmatpush.bf16.msrb.mxu2 %v2073_v52  ;;  %v2125_v52 = vor.u32 %v2507_v39, %v2122_v40  ;;  %v2523_v33 = vld [vmem:[%s3721_s3 + $0x36c] sm:$0xf]  ;;  %v2138_v3 = vld [vmem:[%s3721_s3 + $0x318] sm:$0xf0]  ;;  %v2562_v26 = vld [vmem:[%s3724_s5 + $0xa0] sm:$0xff] }
  0xbd   :  { %1214 = vmatpush.bf16.msrb.mxu3 %v2201_v53  ;;  %1177 = vmatpush.bf16.msrb.mxu0 %v1785_v57  ;;  %v2253_v53 = vor.u32 %v2539_v43, %v2250_v44  ;;  %v1837_v57 = vor.u32 %v2435_v45, %v1834_v47  ;;  %v2451_v37 = vld [vmem:[%s3721_s3 + $0x12c] sm:$0xf]  ;;  %v1773_v43 = vor.u32 %v2419_v35, %v1770_v36 }
  0xbe   :  { %1190 = vmatpush.bf16.msrb.mxu1 %v1913_v58  ;;  %v1965_v58 = vor.u32 %v2467_v48, %v1962_v50  ;;  %v1901_v44 = vor.u32 %v2451_v37, %v1898_v38  ;;  %v2519_v45 = vld [vmem:[%s3721_s3 + $0x34c] sm:$0xf]  ;;  %v1754_v48 = vld [vmem:[%s3721_s3 + $0x18] sm:$0xf0] }
  0xbf   :  { %1154 = vmatmul.bf16.vlgmr.msra.gmra.mxu2 %v3255_v12  ;;  %v2415_v47 = vld [vmem:[%s3721_s3 + $0xc] sm:$0xf] }
  0xc0   :  { %1167 = vmatmul.bf16.vlgmr.msra.gmra.mxu3 %v3266_v18  ;;  %1202 = vmatpush.bf16.msrb.mxu2 %v2057_v1  ;;  %v2109_v1 = vor.u32 %v2503_v55, %v2106_v56  ;;  %v2447_v50 = vld [vmem:[%s3721_s3 + $0x10c] sm:$0xf]  ;;  %v2026_v56 = vld [vmem:[%s3721_s3 + $0x238] sm:$0xf0] }
  0xc1   :  { %1215 = vmatpush.bf16.msrb.mxu3 %v2185_v2  ;;  %1178 = vmatpush.bf16.msrb.mxu0 %v1769_v6  ;;  %v2237_v2 = vor.u32 %v2535_v59, %v2234_v60  ;;  %v1949_v6 = vor.u32 %v2463_v63, %v1946_v0  ;;  %v2483_v55 = vld [vmem:[%s3721_s3 + $0x22c] sm:$0xf]  ;;  %v2154_v60 = vld [vmem:[%s3721_s3 + $0x338] sm:$0xf0] }
  0xc2   :  { %1191 = vmatpush.bf16.msrb.mxu1 %v1897_v7  ;;  %v2531_v7 = vld [vmem:[%s3721_s3 + $0x3ac] sm:$0xf]  ;;  %v2029_v62 = vor.u32 %v2483_v55, %v2026_v56 }
  0xc3   :  { %v2515_v59 = vld [vmem:[%s3721_s3 + $0x32c] sm:$0xf] }
  0xc4   :  { %1203 = vmatpush.bf16.msrb.mxu2 %v2041_v15  ;;  %v2221_v15 = vor.u32 %v2531_v7, %v2218_v8  ;;  %v2157_v63 = vor.u32 %v2515_v59, %v2154_v60  ;;  %v2479_v0 = vld [vmem:[%s3721_s3 + $0x20c] sm:$0xf]  ;;  %v2546_v8 = vld [vmem:[%s3724_s5 + $0x20] sm:$0xff] }
  0xc5   :  { %1216 = vmatpush.bf16.msrb.mxu3 %v2169_v20  ;;  %1179 = vmatpush.bf16.msrb.mxu0 %v1753_v23  ;;  %v1933_v20 = vor.u32 %v2459_v11, %v1930_v13  ;;  %v2423_v23 = vld [vmem:[%s3721_s3 + $0x4c] sm:$0xf]  ;;  %v2542_v11 = vld [vmem:[%s3724_s5] sm:$0xff] }
  0xc6   :  { %1192 = vmatpush.bf16.msrb.mxu1 %v1881_v24  ;;  %v1786_v24 = vld [vmem:[%s3721_s3 + $0x58] sm:$0xf0]  ;;  %v2547_v7 = vld [vmem:[%s3724_s5 + $0x28] sm:$0xff]  ;;  %v2554_v13 = vld [vmem:[%s3724_s5 + $0x60] sm:$0xff] }
  0xc7   :  { %v1789_v31 = vor.u32 %v2423_v23, %v1786_v24  ;;  %v2543_v9 = vld [vmem:[%s3724_s5 + $0x8] sm:$0xff] }
  0xc8   :  { %1204 = vmatpush.bf16.msrb.mxu2 %v2025_v30  ;;  %1180 = vmatmul.bf16.vlgmr.msrb.gmra.mxu0 %v3213_v49  ;;  %v2058_v30 = vld [vmem:[%s3721_s3 + $0x278] sm:$0xf0]  ;;  %v2555_v10 = vld [vmem:[%s3724_s5 + $0x68] sm:$0xff] }
  0xc9   :  { %1224 = vmatpush.bf16.msra.mxu0 %v1869_v27  ;;  %1217 = vmatpush.bf16.msrb.mxu3 %v2153_v34  ;;  %v2077_v27 = vor.u32 %v2495_v16, %v2074_v17  ;;  %v2186_v34 = vld [vmem:[%s3721_s3 + $0x378] sm:$0xf0]  ;;  %v2061_v39 = vor.u32 %v2491_v29, %v2058_v30  ;;  %v2552_v16 = vld [vmem:[%s3724_s5 + $0x50] sm:$0xff]  ;;  %v2559_v36 = vld [vmem:[%s3724_s5 + $0x88] sm:$0xff] }
  0xca   :  { %1237 = vmatpush.bf16.msra.mxu1 %v1997_v28  ;;  %v2205_v28 = vor.u32 %v2527_v21, %v2202_v22  ;;  %v2189_v40 = vor.u32 %v2523_v33, %v2186_v34  ;;  %v2564_v17 = vld [vmem:[%s3724_s5 + $0xb0] sm:$0xff]  ;;  %v2563_v21 = vld [vmem:[%s3724_s5 + $0xa8] sm:$0xff] }
  0xcb   :  { %1193 = vmatmul.bf16.vlgmr.msrb.gmra.mxu1 %v3221_v54 }
  0xcc   :  { %1205 = vmatpush.bf16.msrb.mxu2 %v2009_v46  ;;  %v2170_v46 = vld [vmem:[%s3721_s3 + $0x358] sm:$0xf0] }
  0xcd   :  { %1225 = vmatpush.bf16.msra.mxu0 %v1853_v41  ;;  %1218 = vmatpush.bf16.msrb.mxu3 %v2137_v51  ;;  %v2487_v41 = vld [vmem:[%s3721_s3 + $0x24c] sm:$0xf]  ;;  %v1882_v51 = vld [vmem:[%s3721_s3 + $0x118] sm:$0xf0] }
  0xce   :  { %1238 = vmatpush.bf16.msra.mxu1 %v1981_v42  ;;  %v2042_v42 = vld [vmem:[%s3721_s3 + $0x258] sm:$0xf0] }
  0xcf   :  { %1206 = vmatmul.bf16.vlgmr.msrb.gmra.mxu2 %v3255_v12 }
  0xd0   :  { %1250 = vmatpush.bf16.msra.mxu2 %v2125_v52  ;;  %1219 = vmatmul.bf16.vlgmr.msrb.gmra.mxu3 %v3266_v18  ;;  %v2045_v52 = vor.u32 %v2487_v41, %v2042_v42  ;;  %v2558_v41 = vld [vmem:[%s3724_s5 + $0x80] sm:$0xff]  ;;  %v2573_v42 = vld [vmem:[%s3724_s5 + $0xf8] sm:$0xff] }
  0xd1   :  { %1263 = vmatpush.bf16.msra.mxu3 %v2253_v53  ;;  %1226 = vmatpush.bf16.msra.mxu0 %v1837_v57  ;;  %v2173_v53 = vor.u32 %v2519_v45, %v2170_v46  ;;  %v1757_v57 = vor.u32 %v2415_v47, %v1754_v48  ;;  %v2572_v47 = vld [vmem:[%s3724_s5 + $0xf0] sm:$0xff] }
  0xd2   :  { %1239 = vmatpush.bf16.msra.mxu1 %v1965_v58  ;;  %v1885_v58 = vor.u32 %v2447_v50, %v1882_v51 }
  0xd4   :  { %1251 = vmatpush.bf16.msra.mxu2 %v2109_v1  ;;  %v2010_v1 = vld [vmem:[%s3721_s3 + $0x218] sm:$0xf0] }
  0xd5   :  { %1264 = vmatpush.bf16.msra.mxu3 %v2237_v2  ;;  %1227 = vmatpush.bf16.msra.mxu0 %v1821_v5  ;;  %v2511_v2 = vld [vmem:[%s3721_s3 + $0x30c] sm:$0xf]  ;;  %v2013_v5 = vor.u32 %v2479_v0, %v2010_v1 }
  0xd6   :  { %1240 = vmatpush.bf16.msra.mxu1 %v1949_v6  ;;  %v2141_v6 = vor.u32 %v2511_v2, %v2138_v3 }
  0xd8   :  { %1252 = vmatpush.bf16.msra.mxu2 %v2093_v14  ;;  %v2553_v14 = vld [vmem:[%s3724_s5 + $0x58] sm:$0xff] }
  0xd9   :  { %1265 = vmatpush.bf16.msra.mxu3 %v2221_v15  ;;  %1228 = vmatpush.bf16.msra.mxu0 %v1805_v19  ;;  %v2565_v15 = vld [vmem:[%s3724_s5 + $0xb8] sm:$0xff]  ;;  %v3660_v19 = vld [vmem:[%s3726_s4] sm:$0xf] }
  0xda   :  { %1241 = vmatpush.bf16.msra.mxu1 %v1933_v20  ;;  %v2551_v20 = vld [vmem:[%s3724_s5 + $0x48] sm:$0xff]  ;;  %v420_v24 = vperm.slane %v3660_v19, 0  ;;  %v422_v1 = vperm.slane %v3660_v19, 2 }
  0xdc   :  { %1253 = vmatpush.bf16.msra.mxu2 %v2077_v27 }
  0xdd   :  { %1266 = vmatpush.bf16.msra.mxu3 %v2205_v28  ;;  %1229 = vmatpush.bf16.msra.mxu0 %v1789_v31  ;;  %v2561_v28 = vld [vmem:[%s3724_s5 + $0x98] sm:$0xff] }
  0xde   :  { %1242 = vmatpush.bf16.msra.mxu1 %v1917_v32  ;;  %v2560_v32 = vld [vmem:[%s3724_s5 + $0x90] sm:$0xff] }
  0xe0   :  { %1254 = vmatpush.bf16.msra.mxu2 %v2061_v39 }
  0xe1   :  { %1267 = vmatpush.bf16.msra.mxu3 %v2189_v40  ;;  %1230 = vmatpush.bf16.msra.mxu0 %v1773_v43 }
  0xe2   :  { %1243 = vmatpush.bf16.msra.mxu1 %v1901_v44  ;;  %v421_v44 = vperm.slane %v3660_v19, 1 }
  0xe4   :  { %1255 = vmatpush.bf16.msra.mxu2 %v2045_v52  ;;  %v2571_v52 = vld [vmem:[%s3724_s5 + $0xe8] sm:$0xff] }
  0xe5   :  { %1268 = vmatpush.bf16.msra.mxu3 %v2173_v53  ;;  %1231 = vmatpush.bf16.msra.mxu0 %v1757_v57 }
  0xe6   :  { %1244 = vmatpush.bf16.msra.mxu1 %v1885_v58  ;;  %v2570_v58 = vld [vmem:[%s3724_s5 + $0xe0] sm:$0xff] }
  0xe8   :  { %1256 = vmatpush.bf16.msra.mxu2 %v2029_v62  ;;  %1232 = vmatmul.bf16.vlgmr.msra.gmra.mxu0 %v3213_v49  ;;  %v2557_v49 = vld [vmem:[%s3724_s5 + $0x78] sm:$0xff] }
  0xe9   :  { %1544 = vmatpush.bf16.msrb.mxu0 %v2549_v61  ;;  %1269 = vmatpush.bf16.msra.mxu3 %v2157_v63  ;;  %v2569_v61 = vld [vmem:[%s3724_s5 + $0xd8] sm:$0xff] }
  0xea   :  { %1245 = vmatmul.bf16.vlgmr.msra.gmra.mxu1 %v3221_v54  ;;  %v2545_v54 = vld [vmem:[%s3724_s5 + $0x18] sm:$0xff] }
  0xeb   :  { %1557 = vmatpush.bf16.msrb.mxu1 %v2557_v49 }
  0xec   :  { %1257 = vmatpush.bf16.msra.mxu2 %v2013_v5 }
  0xed   :  { %1545 = vmatpush.bf16.msrb.mxu0 %v2548_v4  ;;  %1270 = vmatpush.bf16.msra.mxu3 %v2141_v6  ;;  %v2568_v4 = vld [vmem:[%s3724_s5 + $0xd0] sm:$0xff] }
  0xef   :  { %1258 = vmatmul.bf16.vlgmr.msra.gmra.mxu2 %v3255_v12  ;;  %v2544_v12 = vld [vmem:[%s3724_s5 + $0x10] sm:$0xff] }
  0xf0   :  { %1271 = vmatmul.bf16.vlgmr.msra.gmra.mxu3 %v3266_v18  ;;  %v2556_v18 = vld [vmem:[%s3724_s5 + $0x70] sm:$0xff]  ;;  %1570 = vmatpush.bf16.msrb.mxu2 %v2565_v15 }
  0xf1   :  { %1546 = vmatpush.bf16.msrb.mxu0 %v2547_v7  ;;  %1558 = vmatpush.bf16.msrb.mxu1 %v2556_v18 }
  0xf2   :  { %1583 = vmatpush.bf16.msrb.mxu3 %v2573_v42 }
  0xf4   :  { %1571 = vmatpush.bf16.msrb.mxu2 %v2564_v17 }
  0xf5   :  { %1547 = vmatpush.bf16.msrb.mxu0 %v2546_v8  ;;  %1559 = vmatpush.bf16.msrb.mxu1 %v2555_v10  ;;  %v2567_v8 = vld [vmem:[%s3724_s5 + $0xc8] sm:$0xff] }
  0xf6   :  { %1584 = vmatpush.bf16.msrb.mxu3 %v2572_v47 }
  0xf8   :  { %1572 = vmatpush.bf16.msrb.mxu2 %v2563_v21 }
  0xf9   :  { %1548 = vmatpush.bf16.msrb.mxu0 %v2545_v54  ;;  %1560 = vmatpush.bf16.msrb.mxu1 %v2554_v13 }
  0xfa   :  { %1585 = vmatpush.bf16.msrb.mxu3 %v2571_v52 }
  0xfc   :  { %1573 = vmatpush.bf16.msrb.mxu2 %v2562_v26 }
  0xfd   :  { %1549 = vmatpush.bf16.msrb.mxu0 %v2544_v12  ;;  %1561 = vmatpush.bf16.msrb.mxu1 %v2553_v14 }
  0xfe   :  { %1586 = vmatpush.bf16.msrb.mxu3 %v2570_v58 }
 0x100   :  { %1574 = vmatpush.bf16.msrb.mxu2 %v2561_v28 }
 0x101   :  { %1550 = vmatpush.bf16.msrb.mxu0 %v2543_v9  ;;  %1562 = vmatpush.bf16.msrb.mxu1 %v2552_v16  ;;  %v2566_v9 = vld [vmem:[%s3724_s5 + $0xc0] sm:$0xff] }
 0x102   :  { %1587 = vmatpush.bf16.msrb.mxu3 %v2569_v61 }
 0x104   :  { %1575 = vmatpush.bf16.msrb.mxu2 %v2560_v32 }
 0x105   :  { %1551 = vmatpush.bf16.msrb.mxu0 %v2542_v11  ;;  %1563 = vmatpush.bf16.msrb.mxu1 %v2551_v20  ;;  %v423_v20 = vperm.slane %v3660_v19, 3  ;;  %v2574_v19 = vld [vmem:[%s3725_s6] ss:$0 sm:$0xff] }
 0x106   :  { %1588 = vmatpush.bf16.msrb.mxu3 %v2568_v4 }
 0x108   :  { %1576 = vmatpush.bf16.msrb.mxu2 %v2559_v36 }
 0x109   :  { %1564 = vmatpush.bf16.msrb.mxu1 %v2550_v25 }
 0x10a   :  { %1589 = vmatpush.bf16.msrb.mxu3 %v2567_v8 }
 0x10c   :  { %1577 = vmatpush.bf16.msrb.mxu2 %v2558_v41 }
 0x10e   :  { %1590 = vmatpush.bf16.msrb.mxu3 %v2566_v9 }
 0x124   :  { %v1077_v22 = vpop.f32.mrf.mxu0 }
 0x125   :  { %v1090_v23 = vpop.f32.mrf.mxu1  ;;  %v1078_v27 = vadd.f32 %v1077_v22, %v420_v24 }
 0x127   :  { %v1091_v31 = vadd.f32 %v1090_v23, %v1078_v27 }
 0x12c   :  { %v1079_v29 = vpop.f32.mrf.mxu0 }
 0x12d   :  { %v1092_v30 = vpop.f32.mrf.mxu1 }
 0x132   :  { %v1103_v33 = vpop.f32.mrf.mxu2 }
 0x133   :  { %v1104_v34 = vadd.f32 %v1103_v33, %v1091_v31  ;;  %v1116_v35 = vpop.f32.mrf.mxu3 }
 0x134   :  { %v1129_v38 = vpop.f32.mrf.mxu0 }
 0x135   :  { %v1117_v37 = vadd.f32 %v1116_v35, %v1104_v34  ;;  %v1142_v39 = vpop.f32.mrf.mxu1  ;;  %v1130_v48 = vadd.f32 %v1129_v38, %v421_v44 }
 0x137   :  { %v1276_v40 = vmax.f32 %v1117_v37, 0.0  ;;  %v1143_v53 = vadd.f32 %v1142_v39, %v1130_v48  ;;  %v1596_v39 = vlaneseq }
 0x139   :  { %v1280_v43 = vpack.c.bf16 %v1276_v40, %v1276_v40  ;;  %v1597_v41 = vand.u32 127, %v1596_v39 }
 0x13a   :  { %v1105_v45 = vpop.f32.mrf.mxu2 }
 0x13b   :  { %v1118_v46 = vpop.f32.mrf.mxu3  ;;  %1552 = vmatmul.bf16.vlgmr.msrb.gmra.mxu0 %v1280_v43  ;;  %vm1598_vm0 = vcmp.lt.s32.totalorder %v1597_v41, 3 }
 0x13c   :  { %v1131_v50 = vpop.f32.mrf.mxu0 }
 0x13d   :  { %v1144_v51 = vpop.f32.mrf.mxu1 }
 0x142   :  { %v1155_v55 = vpop.f32.mrf.mxu2 }
 0x143   :  { %v1156_v56 = vadd.f32 %v1155_v55, %v1143_v53  ;;  %v1168_v57 = vpop.f32.mrf.mxu3 }
 0x145   :  { %v1169_v59 = vadd.f32 %v1168_v57, %v1156_v56  ;;  %v1181_v60 = vpop.f32.mrf.mxu0 }
 0x146   :  { %v1182_v5 = vadd.f32 %v1181_v60, %v422_v1 }
 0x147   :  { %v1277_v62 = vmax.f32 %v1169_v59, 0.0 }
 0x148   :  { %v1194_v63 = vpop.f32.mrf.mxu1 }
 0x149   :  { %v1281_v0 = vpack.c.bf16 %v1277_v62, %v1277_v62  ;;  %v1195_v49 = vadd.f32 %v1194_v63, %v1182_v5 }
 0x14a   :  { %v1157_v2 = vpop.f32.mrf.mxu2 }
 0x14b   :  { %v1170_v3 = vpop.f32.mrf.mxu3  ;;  %1565 = vmatmul.bf16.vlgmr.msrb.gmra.mxu1 %v1281_v0 }
 0x14d   :  { %v1183_v6 = vpop.f32.mrf.mxu0 }
 0x150   :  { %v1196_v7 = vpop.f32.mrf.mxu1 }
 0x152   :  { %v1207_v54 = vpop.f32.mrf.mxu2 }
 0x153   :  { %v1220_v12 = vpop.f32.mrf.mxu3  ;;  %v1208_v18 = vadd.f32 %v1207_v54, %v1195_v49 }
 0x155   :  { %v1221_v10 = vadd.f32 %v1220_v12, %v1208_v18 }
 0x157   :  { %v1278_v11 = vmax.f32 %v1221_v10, 0.0 }
 0x159   :  { %v1282_v13 = vpack.c.bf16 %v1278_v11, %v1278_v11 }
 0x15a   :  { %v1209_v14 = vpop.f32.mrf.mxu2 }
 0x15b   :  { %v1222_v15 = vpop.f32.mrf.mxu3  ;;  %1578 = vmatmul.bf16.vlgmr.msrb.gmra.mxu2 %v1282_v13 }
 0x165   :  { %v1233_v16 = vpop.f32.mrf.mxu0 }
 0x166   :  { %v1234_v21 = vadd.f32 %v1233_v16, %v423_v20 }
 0x167   :  { %v1246_v17 = vpop.f32.mrf.mxu1 }
 0x168   :  { %v1247_v24 = vadd.f32 %v1246_v17, %v1234_v21 }
 0x16d   :  { %v1235_v22 = vpop.f32.mrf.mxu0 }
 0x16f   :  { %v1248_v23 = vpop.f32.mrf.mxu1 }
 0x172   :  { %v1259_v25 = vpop.f32.mrf.mxu2 }
 0x173   :  { %v1260_v26 = vadd.f32 %v1259_v25, %v1247_v24  ;;  %v1272_v27 = vpop.f32.mrf.mxu3 }
 0x175   :  { %v1273_v28 = vadd.f32 %v1272_v27, %v1260_v26 }
 0x177   :  { %v1279_v29 = vmax.f32 %v1273_v28, 0.0 }
 0x179   :  { %v1283_v30 = vpack.c.bf16 %v1279_v29, %v1279_v29 }
 0x17a   :  { %v1261_v31 = vpop.f32.mrf.mxu2 }
 0x17b   :  { %v1274_v32 = vpop.f32.mrf.mxu3  ;;  %1591 = vmatmul.bf16.vlgmr.msrb.gmra.mxu3 %v1283_v30 }
 0x1b8   :  { %v1553_v33 = vpop.f32.mrf.mxu0 }
 0x1b9   :  { %v1554_v40 = vadd.f32 %v2574_v19, %v1553_v33 }
 0x1c0   :  { %v1555_v34 = vpop.f32.mrf.mxu0 }
 0x1c8   :  { %v1566_v35 = vpop.f32.mrf.mxu1 }
 0x1c9   :  { %v1567_v42 = vadd.f32 %v1566_v35, %v1554_v40 }
 0x1d0   :  { %v1568_v36 = vpop.f32.mrf.mxu1 }
 0x1de   :  { %v1579_v37 = vpop.f32.mrf.mxu2 }
 0x1df   :  { %v1580_v43 = vadd.f32 %v1579_v37, %v1567_v42 }
 0x1e6   :  { %v1581_v38 = vpop.f32.mrf.mxu2 }
 0x1fe   :  { %v1592_v44 = vpop.f32.mrf.mxu3 }
 0x1ff   :  { %v1593_v45 = vadd.f32 %v1592_v44, %v1580_v43 }
 0x201   :  { %v1599_v46 = vsel %vm1598_vm0, %v1593_v45, -inf }
 0x202   :  { %1600 = vmax.xlane.f32.xlu0 %v1599_v46 }
 0x206   :  { %v1594_v47 = vpop.f32.mrf.mxu3 }
 0x275   :  { %v1601_v48 = vpop.xlane.xlu0 %1600 }
 0x276   :  { %v1602_v50 = vsub.f32 %v1599_v46, %v1601_v48 }
 0x278   :  { %v1603_v51 = vmul.f32 1.442695, %v1602_v50 }
 0x27a   :  { %2575 = vpow2.f32 %v1603_v51 }
 0x280   :  { %v2576_v52 = vpop.eup %2575 }
 0x281   :  { %1605 = vadd.xlane.f32.xlu0 %v2576_v52 }
 0x2f4   :  { %v1606_v53 = vpop.xlane.xlu0 %1605 }
 0x2f5   :  { %2577 = vrcp.f32 %v1606_v53 }
 0x2fb   :  { %v2578_v55 = vpop.eup %2577 }
 0x2fc   :  { %v1608_v56 = vmul.f32 %v2578_v55, %v2576_v52 }
 0x2fe   :  { %1609 = vst [vmem:[%s3727_s7] sm:$0xff] %v1608_v56 }

</bundles_post_ra>
